<compile_context>
chip_gen: v5e
topology: v5e:2x2
jax: 0.10.0
libtpu: 0.0.40
codegen_flags: <defaults>
</compile_context>

<pallas_src>
import functools

import numpy as np
import jax
import jax.numpy as jnp
from jax import lax
from jax.experimental import pallas as pl
from jax.experimental.pallas import tpu as pltpu


# ----------------------------------------------------------------------------
# Pallas kernel
# ----------------------------------------------------------------------------
def _silu(v):
    # sigmoid lowers exp/reciprocal to the EUP slot (free vs. VALU divide).
    return v * jax.nn.sigmoid(v)


def repc3_kernel(x_ref, masks_ref, wcv12_ref, bcv12_ref, wrep_ref,
                 out_ref, slab_ref, *, n_rep, img_w):
    dot = functools.partial(jnp.dot, preferred_element_type=jnp.float32)
    hw = x_ref.shape[-1]
    c_ = out_ref.shape[1]

    x = x_ref[0]                                     # (C1, HW) f32, lane-dense

    # cv1 & cv2 fused: one (2*C2, C1) @ (C1, HW) bf16 MXU matmul + folded BN.
    y12 = _silu(dot(wcv12_ref[...], x.astype(jnp.bfloat16)) + bcv12_ref[...])
    h = y12[:c_]                                     # cv1 branch -> rep chain
    y2 = y12[c_:]                                    # cv2 branch (residual)

    # Constant ones row so the RepConv biases ride through the MXU (the fused
    # weight carries a bias column).  Written once; the rep loop only rewrites
    # rows [0, 9*C_).
    slab_ref[9 * c_:9 * c_ + 1, :] = jnp.ones((1, hw), jnp.float32)

    masks = masks_ref[...]                           # (8, HW) f32, non-center taps

    # 3x3 tap offsets in row-major flattened (H*W) coordinates (ky-major).
    taps = [(ky - 1, kx - 1) for ky in range(3) for kx in range(3)]

    # self.m : chain of RepConv(c_, c_) (bn=False -> no identity branch).
    # n_rep is small (3) -> static unroll.
    for i in range(n_rep):
        j = 0
        for t, (dy, dx) in enumerate(taps):
            if dy == 0 and dx == 0:
                # Center 3x3 tap and the 1x1 branch share this slab slice
                # (their weights were summed host-side).
                slab_ref[t * c_:(t + 1) * c_, :] = h
            else:
                s = dy * img_w + dx
                # out[:, p] = h[:, p + s]  (zero-padded via boundary mask)
                rolled = pltpu.roll(h, shift=(-s) % hw, axis=1)        # XLU
                slab_ref[t * c_:(t + 1) * c_, :] = rolled * masks[j:j + 1, :]
                j += 1
        # One fused bf16 MXU matmul: 9 taps + merged 1x1 branch + both BN biases.
        h = _silu(dot(wrep_ref[i], slab_ref[...].astype(jnp.bfloat16)))

    # cv3 is nn.Identity because c_ == c2 (e = 1.0); residual add.
    out_ref[0] = h + y2


# ----------------------------------------------------------------------------
# Glue: boundary masks, parameter init (BN folded), wrapper, reference
# ----------------------------------------------------------------------------
def build_shift_masks(H, W):
    """(8, H*W) float masks, non-center 3x3 taps in ky-major order:
    1 where the shifted tap stays inside the image (zero padding elsewhere)."""
    p = np.arange(H * W)
    y, x = p // W, p % W
    rows = []
    for ky in range(3):
        for kx in range(3):
            dy, dx = ky - 1, kx - 1
            if dy == 0 and dx == 0:
                continue
            valid = (y + dy >= 0) & (y + dy < H) & (x + dx >= 0) & (x + dx < W)
            rows.append(valid.astype(np.float32))
    return jnp.asarray(np.stack(rows, axis=0))


def _fold_bn(w, gamma, beta, mean, var, eps=1e-5):
    scale = gamma / jnp.sqrt(var + eps)
    w_eff = w * scale[:, None, None, None]
    b_eff = beta - mean * scale
    return w_eff, b_eff


def _make_conv_bn(key, cin, cout, k):
    """Conv2d(bias=False) + BatchNorm2d, folded to (w_eff, b_eff) in OIHW."""
    k1, k2, k3, k4, k5 = jax.random.split(key, 5)
    w = jax.random.normal(k1, (cout, cin, k, k), jnp.float32) / np.sqrt(cin * k * k)
    gamma = 1.0 + 0.1 * jax.random.normal(k2, (cout,), jnp.float32)
    beta = 0.1 * jax.random.normal(k3, (cout,), jnp.float32)
    mean = 0.1 * jax.random.normal(k4, (cout,), jnp.float32)
    var = 1.0 + 0.1 * jax.random.uniform(k5, (cout,), jnp.float32)
    return _fold_bn(w, gamma, beta, mean, var)


def init_repc3_params(key, c1, c2, n, e=1.0):
    c_ = int(c2 * e)
    assert c_ == c2, "cv3 is nn.Identity only when c_ == c2 (e = 1.0)"
    keys = jax.random.split(key, 2 + 2 * n)
    cv1_w, cv1_b = _make_conv_bn(keys[0], c1, c2, 1)
    cv2_w, cv2_b = _make_conv_bn(keys[1], c1, c2, 1)
    rep_w3, rep_b3, rep_w1, rep_b1 = [], [], [], []
    for i in range(n):
        w3, b3 = _make_conv_bn(keys[2 + 2 * i], c_, c_, 3)   # RepConv.conv1 (3x3)
        w1, b1 = _make_conv_bn(keys[3 + 2 * i], c_, c_, 1)   # RepConv.conv2 (1x1)
        rep_w3.append(w3); rep_b3.append(b3)
        rep_w1.append(w1); rep_b1.append(b1)

    p = dict(cv1_w=cv1_w, cv1_b=cv1_b, cv2_w=cv2_w, cv2_b=cv2_b,
             rep_w3=jnp.stack(rep_w3), rep_b3=jnp.stack(rep_b3),
             rep_w1=jnp.stack(rep_w1), rep_b1=jnp.stack(rep_b1))

    # ---- Kernel layouts (channels-on-sublane, y = W @ x) -------------------
    # cv1 + cv2 fused into a single matmul; weights bf16, bias stays f32.
    p['cv12_wk'] = jnp.concatenate(
        [cv1_w[:, :, 0, 0], cv2_w[:, :, 0, 0]], axis=0).astype(jnp.bfloat16)   # (2*C2, C1)
    p['cv12_bk'] = jnp.concatenate([cv1_b, cv2_b], axis=0)[:, None]            # (2*C2, 1)

    # Fused RepConv weight: 9 tap blocks (ky-major; center block also carries
    # the 1x1 branch) + a trailing bias column -> (C_, 9*C_ + 1), bf16.
    fused = []
    for i in range(n):
        parts = []
        for ky in range(3):
            for kx in range(3):
                blk = p['rep_w3'][i, :, :, ky, kx]
                if ky == 1 and kx == 1:
                    blk = blk + p['rep_w1'][i, :, :, 0, 0]
                parts.append(blk)
        parts.append((p['rep_b3'][i] + p['rep_b1'][i])[:, None])   # bias column
        fused.append(jnp.concatenate(parts, axis=1))
    p['rep_wk'] = jnp.stack(fused).astype(jnp.bfloat16)            # (n, C_, 9*C_+1)
    return p


def repc3_pallas(x_nchw, params, n_rep):
    N, C1, H, W = x_nchw.shape
    C2 = params['cv12_wk'].shape[0] // 2
    HW = H * W

    x3d = x_nchw.reshape(N, C1, HW)        # NCHW flattens natively to (N, C, HW)
    masks = build_shift_masks(H, W)        # (8, HW) f32, dense sublanes

    kernel = functools.partial(repc3_kernel, n_rep=n_rep, img_w=W)
    out3d = pl.pallas_call(
        kernel,
        out_shape=jax.ShapeDtypeStruct((N, C2, HW), jnp.float32),
        grid=(N,),
        in_specs=[
            pl.BlockSpec((1, C1, HW), lambda b: (b, 0, 0)),             # x tile
            pl.BlockSpec((8, HW), lambda b: (0, 0)),                    # masks
            pl.BlockSpec((2 * C2, C1), lambda b: (0, 0)),               # cv1+cv2 w (bf16)
            pl.BlockSpec((2 * C2, 1), lambda b: (0, 0)),                # cv1+cv2 b (f32)
            pl.BlockSpec((n_rep, C2, 9 * C2 + 1), lambda b: (0, 0, 0)), # fused rep w (bf16)
        ],
        out_specs=pl.BlockSpec((1, C2, HW), lambda b: (b, 0, 0)),
        scratch_shapes=[pltpu.VMEM((9 * C2 + 1, HW), jnp.float32)],     # tap slab
        compiler_params=pltpu.CompilerParams(
            dimension_semantics=("parallel",)),
    )(x3d, masks, params['cv12_wk'], params['cv12_bk'], params['rep_wk'])

    return out3d.reshape(N, C2, H, W)


def ref_forward(x, params, n_rep):
    """Pure-JAX NCHW reference (BN folded, eval semantics) for validation."""
    def conv_bn(inp, w, b, act):
        k = w.shape[-1]
        pad = (k - 1) // 2
        y = lax.conv_general_dilated(
            inp, w, window_strides=(1, 1), padding=((pad, pad), (pad, pad)),
            dimension_numbers=('NCHW', 'OIHW', 'NCHW'),
            precision=lax.Precision.HIGHEST)
        y = y + b[None, :, None, None]
        return y * jax.nn.sigmoid(y) if act else y

    h = conv_bn(x, params['cv1_w'], params['cv1_b'], True)
    for i in range(n_rep):
        s = (conv_bn(h, params['rep_w3'][i], params['rep_b3'][i], False)
             + conv_bn(h, params['rep_w1'][i], params['rep_b1'][i], False))
        h = s * jax.nn.sigmoid(s)
    y2 = conv_bn(x, params['cv2_w'], params['cv2_b'], True)
    return h + y2   # cv3 == nn.Identity (c_ == c2)


# ----------------------------------------------------------------------------
if __name__ == "__main__":
    key = jax.random.PRNGKey(0)
    kx, kp = jax.random.split(key)

    N, C1, H, W = 2, 4, 16, 16       # RepC3(c1=4, c2=8, n=3, e=1.0)
    C2, N_REP = 8, 3

    x = jax.random.normal(kx, (N, C1, H, W), jnp.float32)
    params = init_repc3_params(kp, C1, C2, N_REP, e=1.0)

    out = repc3_pallas(x, params, N_REP)
    out = jax.block_until_ready(out)

    ref = ref_forward(x, params, N_REP)
    err = float(jnp.max(jnp.abs(out - ref)))
    scale = float(jnp.max(jnp.abs(ref)))
    rel = err / max(scale, 1.0)
    assert out.shape == (N, C2, H, W), out.shape
    # bf16 MXU operands (f32 accumulation): expect ~1e-2 relative error.
    assert np.isfinite(err) and rel < 5e-2, f"max abs err = {err}, rel = {rel}"
    print("KERNEL_OK")
</pallas_src>

<mosaic_0001>
module attributes {stable_mosaic.version = 11 : i64} {
  func.func @repc3_kernel(%arg0: i32, %arg1: memref<1x4x256xf32, #tpu.memory_space<vmem>>, %arg2: memref<8x256xf32, #tpu.memory_space<vmem>>, %arg3: memref<16x4xbf16, #tpu.memory_space<vmem>>, %arg4: memref<16x1xf32, #tpu.memory_space<vmem>>, %arg5: memref<3x8x73xbf16, #tpu.memory_space<vmem>>, %arg6: memref<1x8x256xf32, #tpu.memory_space<vmem>>, %arg7: memref<73x256xf32, #tpu.memory_space<vmem>>) attributes {dimension_semantics = [#tpu.dimension_semantics<parallel>], iteration_bounds = array<i64: 2>, scalar_prefetch = 0 : i64, scratch_operands = 1 : i64, tpu.core_type = #tpu.core_type<tc>, window_params = [{transform_indices = @transform_0, window_bounds = array<i64: 1, 4, 256>}, {pipeline_mode = #tpu.pipeline_mode<synchronous>, transform_indices = @transform_1, window_bounds = array<i64: 8, 256>}, {pipeline_mode = #tpu.pipeline_mode<synchronous>, transform_indices = @transform_2, window_bounds = array<i64: 16, 4>}, {pipeline_mode = #tpu.pipeline_mode<synchronous>, transform_indices = @transform_3, window_bounds = array<i64: 16, 1>}, {pipeline_mode = #tpu.pipeline_mode<synchronous>, transform_indices = @transform_4, window_bounds = array<i64: 3, 8, 73>}, {transform_indices = @transform_5, window_bounds = array<i64: 1, 8, 256>}]} {
    %c0 = arith.constant 0 : index
    %c0_0 = arith.constant 0 : index
    %c0_1 = arith.constant 0 : index
    %0 = vector.load %arg1[%c0, %c0_0, %c0_1] : memref<1x4x256xf32, #tpu.memory_space<vmem>>, vector<1x4x256xf32>
    %1 = vector.shape_cast %0 : vector<1x4x256xf32> to vector<4x256xf32>
    %c0_2 = arith.constant 0 : index
    %c0_3 = arith.constant 0 : index
    %2 = vector.load %arg3[%c0_2, %c0_3] : memref<16x4xbf16, #tpu.memory_space<vmem>>, vector<16x4xbf16>
    %3 = arith.truncf %1 : vector<4x256xf32> to vector<4x256xbf16>
    %cst = arith.constant dense<0.000000e+00> : vector<16x256xf32>
    %4 = tpu.matmul %2, %3, %cst {dimension_numbers = #tpu.dot_dimension_numbers<[1], [0], [0], [1], [0, 0, 1, 1], [], []>} : vector<16x4xbf16>, vector<4x256xbf16>, vector<16x256xf32> -> vector<16x256xf32>
    %c0_4 = arith.constant 0 : index
    %c0_5 = arith.constant 0 : index
    %5 = vector.load %arg4[%c0_4, %c0_5] : memref<16x1xf32, #tpu.memory_space<vmem>>, vector<16x1xf32>
    %6 = vector.broadcast %5 : vector<16x1xf32> to vector<16x256xf32>
    %7 = arith.addf %4, %6 : vector<16x256xf32>
    %8 = arith.negf %7 : vector<16x256xf32>
    %9 = math.exp %8 : vector<16x256xf32>
    %cst_6 = arith.constant 1.000000e+00 : f32
    %10 = vector.broadcast %cst_6 : f32 to vector<16x256xf32>
    %11 = arith.addf %10, %9 : vector<16x256xf32>
    %12 = arith.divf %10, %11 : vector<16x256xf32>
    %13 = arith.mulf %7, %12 : vector<16x256xf32>
    %14 = vector.extract_strided_slice %13 {offsets = [0, 0], sizes = [8, 256], strides = [1, 1]} : vector<16x256xf32> to vector<8x256xf32>
    %15 = vector.extract_strided_slice %13 {offsets = [8, 0], sizes = [8, 256], strides = [1, 1]} : vector<16x256xf32> to vector<8x256xf32>
    %cst_7 = arith.constant 1.000000e+00 : f32
    %16 = vector.broadcast %cst_7 : f32 to vector<1x256xf32>
    %c72 = arith.constant 72 : index
    %c0_8 = arith.constant 0 : index
    %17 = vector.load %arg7[%c72, %c0_8] : memref<73x256xf32, #tpu.memory_space<vmem>>, vector<1x256xf32>
    tpu.vector_store %arg7[%c72, %c0_8], %16 {strides = array<i32>} : memref<73x256xf32, #tpu.memory_space<vmem>>, vector<1x256xf32>,
    %c0_9 = arith.constant 0 : index
    %c0_10 = arith.constant 0 : index
    %18 = vector.load %arg2[%c0_9, %c0_10] : memref<8x256xf32, #tpu.memory_space<vmem>>, vector<8x256xf32>
    %c17_i32 = arith.constant 17 : i32
    %19 = tpu.dynamic_rotate %14 by %c17_i32 dim 1 : vector<8x256xf32>, i32 -> vector<8x256xf32>
    %20 = vector.extract_strided_slice %18 {offsets = [0, 0], sizes = [1, 256], strides = [1, 1]} : vector<8x256xf32> to vector<1x256xf32>
    %21 = vector.broadcast %20 : vector<1x256xf32> to vector<8x256xf32>
    %22 = arith.mulf %19, %21 : vector<8x256xf32>
    %c0_11 = arith.constant 0 : index
    %c0_12 = arith.constant 0 : index
    %23 = vector.load %arg7[%c0_11, %c0_12] : memref<73x256xf32, #tpu.memory_space<vmem>>, vector<8x256xf32>
    tpu.vector_store %arg7[%c0_11, %c0_12], %22 {strides = array<i32>} : memref<73x256xf32, #tpu.memory_space<vmem>>, vector<8x256xf32>,
    %c16_i32 = arith.constant 16 : i32
    %24 = tpu.dynamic_rotate %14 by %c16_i32 dim 1 : vector<8x256xf32>, i32 -> vector<8x256xf32>
    %25 = vector.extract_strided_slice %18 {offsets = [1, 0], sizes = [1, 256], strides = [1, 1]} : vector<8x256xf32> to vector<1x256xf32>
    %26 = vector.broadcast %25 : vector<1x256xf32> to vector<8x256xf32>
    %27 = arith.mulf %24, %26 : vector<8x256xf32>
    %c8 = arith.constant 8 : index
    %c0_13 = arith.constant 0 : index
    %28 = vector.load %arg7[%c8, %c0_13] : memref<73x256xf32, #tpu.memory_space<vmem>>, vector<8x256xf32>
    tpu.vector_store %arg7[%c8, %c0_13], %27 {strides = array<i32>} : memref<73x256xf32, #tpu.memory_space<vmem>>, vector<8x256xf32>,
    %c15_i32 = arith.constant 15 : i32
    %29 = tpu.dynamic_rotate %14 by %c15_i32 dim 1 : vector<8x256xf32>, i32 -> vector<8x256xf32>
    %30 = vector.extract_strided_slice %18 {offsets = [2, 0], sizes = [1, 256], strides = [1, 1]} : vector<8x256xf32> to vector<1x256xf32>
    %31 = vector.broadcast %30 : vector<1x256xf32> to vector<8x256xf32>
    %32 = arith.mulf %29, %31 : vector<8x256xf32>
    %c16 = arith.constant 16 : index
    %c0_14 = arith.constant 0 : index
    %33 = vector.load %arg7[%c16, %c0_14] : memref<73x256xf32, #tpu.memory_space<vmem>>, vector<8x256xf32>
    tpu.vector_store %arg7[%c16, %c0_14], %32 {strides = array<i32>} : memref<73x256xf32, #tpu.memory_space<vmem>>, vector<8x256xf32>,
    %c1_i32 = arith.constant 1 : i32
    %34 = tpu.dynamic_rotate %14 by %c1_i32 dim 1 : vector<8x256xf32>, i32 -> vector<8x256xf32>
    %35 = vector.extract_strided_slice %18 {offsets = [3, 0], sizes = [1, 256], strides = [1, 1]} : vector<8x256xf32> to vector<1x256xf32>
    %36 = vector.broadcast %35 : vector<1x256xf32> to vector<8x256xf32>
    %37 = arith.mulf %34, %36 : vector<8x256xf32>
    %c24 = arith.constant 24 : index
    %c0_15 = arith.constant 0 : index
    %38 = vector.load %arg7[%c24, %c0_15] : memref<73x256xf32, #tpu.memory_space<vmem>>, vector<8x256xf32>
    tpu.vector_store %arg7[%c24, %c0_15], %37 {strides = array<i32>} : memref<73x256xf32, #tpu.memory_space<vmem>>, vector<8x256xf32>,
    %c32 = arith.constant 32 : index
    %c0_16 = arith.constant 0 : index
    %39 = vector.load %arg7[%c32, %c0_16] : memref<73x256xf32, #tpu.memory_space<vmem>>, vector<8x256xf32>
    tpu.vector_store %arg7[%c32, %c0_16], %14 {strides = array<i32>} : memref<73x256xf32, #tpu.memory_space<vmem>>, vector<8x256xf32>,
    %c255_i32 = arith.constant 255 : i32
    %40 = tpu.dynamic_rotate %14 by %c255_i32 dim 1 : vector<8x256xf32>, i32 -> vector<8x256xf32>
    %41 = vector.extract_strided_slice %18 {offsets = [4, 0], sizes = [1, 256], strides = [1, 1]} : vector<8x256xf32> to vector<1x256xf32>
    %42 = vector.broadcast %41 : vector<1x256xf32> to vector<8x256xf32>
    %43 = arith.mulf %40, %42 : vector<8x256xf32>
    %c40 = arith.constant 40 : index
    %c0_17 = arith.constant 0 : index
    %44 = vector.load %arg7[%c40, %c0_17] : memref<73x256xf32, #tpu.memory_space<vmem>>, vector<8x256xf32>
    tpu.vector_store %arg7[%c40, %c0_17], %43 {strides = array<i32>} : memref<73x256xf32, #tpu.memory_space<vmem>>, vector<8x256xf32>,
    %c241_i32 = arith.constant 241 : i32
    %45 = tpu.dynamic_rotate %14 by %c241_i32 dim 1 : vector<8x256xf32>, i32 -> vector<8x256xf32>
    %46 = vector.extract_strided_slice %18 {offsets = [5, 0], sizes = [1, 256], strides = [1, 1]} : vector<8x256xf32> to vector<1x256xf32>
    %47 = vector.broadcast %46 : vector<1x256xf32> to vector<8x256xf32>
    %48 = arith.mulf %45, %47 : vector<8x256xf32>
    %c48 = arith.constant 48 : index
    %c0_18 = arith.constant 0 : index
    %49 = vector.load %arg7[%c48, %c0_18] : memref<73x256xf32, #tpu.memory_space<vmem>>, vector<8x256xf32>
    tpu.vector_store %arg7[%c48, %c0_18], %48 {strides = array<i32>} : memref<73x256xf32, #tpu.memory_space<vmem>>, vector<8x256xf32>,
    %c240_i32 = arith.constant 240 : i32
    %50 = tpu.dynamic_rotate %14 by %c240_i32 dim 1 : vector<8x256xf32>, i32 -> vector<8x256xf32>
    %51 = vector.extract_strided_slice %18 {offsets = [6, 0], sizes = [1, 256], strides = [1, 1]} : vector<8x256xf32> to vector<1x256xf32>
    %52 = vector.broadcast %51 : vector<1x256xf32> to vector<8x256xf32>
    %53 = arith.mulf %50, %52 : vector<8x256xf32>
    %c56 = arith.constant 56 : index
    %c0_19 = arith.constant 0 : index
    %54 = vector.load %arg7[%c56, %c0_19] : memref<73x256xf32, #tpu.memory_space<vmem>>, vector<8x256xf32>
    tpu.vector_store %arg7[%c56, %c0_19], %53 {strides = array<i32>} : memref<73x256xf32, #tpu.memory_space<vmem>>, vector<8x256xf32>,
    %c239_i32 = arith.constant 239 : i32
    %55 = tpu.dynamic_rotate %14 by %c239_i32 dim 1 : vector<8x256xf32>, i32 -> vector<8x256xf32>
    %56 = vector.extract_strided_slice %18 {offsets = [7, 0], sizes = [1, 256], strides = [1, 1]} : vector<8x256xf32> to vector<1x256xf32>
    %57 = vector.broadcast %56 : vector<1x256xf32> to vector<8x256xf32>
    %58 = arith.mulf %55, %57 : vector<8x256xf32>
    %c64 = arith.constant 64 : index
    %c0_20 = arith.constant 0 : index
    %59 = vector.load %arg7[%c64, %c0_20] : memref<73x256xf32, #tpu.memory_space<vmem>>, vector<8x256xf32>
    tpu.vector_store %arg7[%c64, %c0_20], %58 {strides = array<i32>} : memref<73x256xf32, #tpu.memory_space<vmem>>, vector<8x256xf32>,
    %c0_21 = arith.constant 0 : index
    %c0_22 = arith.constant 0 : index
    %c0_23 = arith.constant 0 : index
    %60 = vector.load %arg5[%c0_21, %c0_22, %c0_23] : memref<3x8x73xbf16, #tpu.memory_space<vmem>>, vector<1x8x73xbf16>
    %61 = vector.shape_cast %60 : vector<1x8x73xbf16> to vector<8x73xbf16>
    %c0_24 = arith.constant 0 : index
    %c0_25 = arith.constant 0 : index
    %62 = vector.load %arg7[%c0_24, %c0_25] : memref<73x256xf32, #tpu.memory_space<vmem>>, vector<73x256xf32>
    %63 = arith.truncf %62 : vector<73x256xf32> to vector<73x256xbf16>
    %cst_26 = arith.constant dense<0.000000e+00> : vector<8x256xf32>
    %64 = tpu.matmul %61, %63, %cst_26 {dimension_numbers = #tpu.dot_dimension_numbers<[1], [0], [0], [1], [0, 0, 1, 1], [], []>} : vector<8x73xbf16>, vector<73x256xbf16>, vector<8x256xf32> -> vector<8x256xf32>
    %65 = arith.negf %64 : vector<8x256xf32>
    %66 = math.exp %65 : vector<8x256xf32>
    %cst_27 = arith.constant 1.000000e+00 : f32
    %67 = vector.broadcast %cst_27 : f32 to vector<8x256xf32>
    %68 = arith.addf %67, %66 : vector<8x256xf32>
    %69 = arith.divf %67, %68 : vector<8x256xf32>
    %70 = arith.mulf %64, %69 : vector<8x256xf32>
    %c17_i32_28 = arith.constant 17 : i32
    %71 = tpu.dynamic_rotate %70 by %c17_i32_28 dim 1 : vector<8x256xf32>, i32 -> vector<8x256xf32>
    %72 = vector.extract_strided_slice %18 {offsets = [0, 0], sizes = [1, 256], strides = [1, 1]} : vector<8x256xf32> to vector<1x256xf32>
    %73 = vector.broadcast %72 : vector<1x256xf32> to vector<8x256xf32>
    %74 = arith.mulf %71, %73 : vector<8x256xf32>
    %c0_29 = arith.constant 0 : index
    %c0_30 = arith.constant 0 : index
    %75 = vector.load %arg7[%c0_29, %c0_30] : memref<73x256xf32, #tpu.memory_space<vmem>>, vector<8x256xf32>
    tpu.vector_store %arg7[%c0_29, %c0_30], %74 {strides = array<i32>} : memref<73x256xf32, #tpu.memory_space<vmem>>, vector<8x256xf32>,
    %c16_i32_31 = arith.constant 16 : i32
    %76 = tpu.dynamic_rotate %70 by %c16_i32_31 dim 1 : vector<8x256xf32>, i32 -> vector<8x256xf32>
    %77 = vector.extract_strided_slice %18 {offsets = [1, 0], sizes = [1, 256], strides = [1, 1]} : vector<8x256xf32> to vector<1x256xf32>
    %78 = vector.broadcast %77 : vector<1x256xf32> to vector<8x256xf32>
    %79 = arith.mulf %76, %78 : vector<8x256xf32>
    %c8_32 = arith.constant 8 : index
    %c0_33 = arith.constant 0 : index
    %80 = vector.load %arg7[%c8_32, %c0_33] : memref<73x256xf32, #tpu.memory_space<vmem>>, vector<8x256xf32>
    tpu.vector_store %arg7[%c8_32, %c0_33], %79 {strides = array<i32>} : memref<73x256xf32, #tpu.memory_space<vmem>>, vector<8x256xf32>,
    %c15_i32_34 = arith.constant 15 : i32
    %81 = tpu.dynamic_rotate %70 by %c15_i32_34 dim 1 : vector<8x256xf32>, i32 -> vector<8x256xf32>
    %82 = vector.extract_strided_slice %18 {offsets = [2, 0], sizes = [1, 256], strides = [1, 1]} : vector<8x256xf32> to vector<1x256xf32>
    %83 = vector.broadcast %82 : vector<1x256xf32> to vector<8x256xf32>
    %84 = arith.mulf %81, %83 : vector<8x256xf32>
    %c16_35 = arith.constant 16 : index
    %c0_36 = arith.constant 0 : index
    %85 = vector.load %arg7[%c16_35, %c0_36] : memref<73x256xf32, #tpu.memory_space<vmem>>, vector<8x256xf32>
    tpu.vector_store %arg7[%c16_35, %c0_36], %84 {strides = array<i32>} : memref<73x256xf32, #tpu.memory_space<vmem>>, vector<8x256xf32>,
    %c1_i32_37 = arith.constant 1 : i32
    %86 = tpu.dynamic_rotate %70 by %c1_i32_37 dim 1 : vector<8x256xf32>, i32 -> vector<8x256xf32>
    %87 = vector.extract_strided_slice %18 {offsets = [3, 0], sizes = [1, 256], strides = [1, 1]} : vector<8x256xf32> to vector<1x256xf32>
    %88 = vector.broadcast %87 : vector<1x256xf32> to vector<8x256xf32>
    %89 = arith.mulf %86, %88 : vector<8x256xf32>
    %c24_38 = arith.constant 24 : index
    %c0_39 = arith.constant 0 : index
    %90 = vector.load %arg7[%c24_38, %c0_39] : memref<73x256xf32, #tpu.memory_space<vmem>>, vector<8x256xf32>
    tpu.vector_store %arg7[%c24_38, %c0_39], %89 {strides = array<i32>} : memref<73x256xf32, #tpu.memory_space<vmem>>, vector<8x256xf32>,
    %c32_40 = arith.constant 32 : index
    %c0_41 = arith.constant 0 : index
    %91 = vector.load %arg7[%c32_40, %c0_41] : memref<73x256xf32, #tpu.memory_space<vmem>>, vector<8x256xf32>
    tpu.vector_store %arg7[%c32_40, %c0_41], %70 {strides = array<i32>} : memref<73x256xf32, #tpu.memory_space<vmem>>, vector<8x256xf32>,
    %c255_i32_42 = arith.constant 255 : i32
    %92 = tpu.dynamic_rotate %70 by %c255_i32_42 dim 1 : vector<8x256xf32>, i32 -> vector<8x256xf32>
    %93 = vector.extract_strided_slice %18 {offsets = [4, 0], sizes = [1, 256], strides = [1, 1]} : vector<8x256xf32> to vector<1x256xf32>
    %94 = vector.broadcast %93 : vector<1x256xf32> to vector<8x256xf32>
    %95 = arith.mulf %92, %94 : vector<8x256xf32>
    %c40_43 = arith.constant 40 : index
    %c0_44 = arith.constant 0 : index
    %96 = vector.load %arg7[%c40_43, %c0_44] : memref<73x256xf32, #tpu.memory_space<vmem>>, vector<8x256xf32>
    tpu.vector_store %arg7[%c40_43, %c0_44], %95 {strides = array<i32>} : memref<73x256xf32, #tpu.memory_space<vmem>>, vector<8x256xf32>,
    %c241_i32_45 = arith.constant 241 : i32
    %97 = tpu.dynamic_rotate %70 by %c241_i32_45 dim 1 : vector<8x256xf32>, i32 -> vector<8x256xf32>
    %98 = vector.extract_strided_slice %18 {offsets = [5, 0], sizes = [1, 256], strides = [1, 1]} : vector<8x256xf32> to vector<1x256xf32>
    %99 = vector.broadcast %98 : vector<1x256xf32> to vector<8x256xf32>
    %100 = arith.mulf %97, %99 : vector<8x256xf32>
    %c48_46 = arith.constant 48 : index
    %c0_47 = arith.constant 0 : index
    %101 = vector.load %arg7[%c48_46, %c0_47] : memref<73x256xf32, #tpu.memory_space<vmem>>, vector<8x256xf32>
    tpu.vector_store %arg7[%c48_46, %c0_47], %100 {strides = array<i32>} : memref<73x256xf32, #tpu.memory_space<vmem>>, vector<8x256xf32>,
    %c240_i32_48 = arith.constant 240 : i32
    %102 = tpu.dynamic_rotate %70 by %c240_i32_48 dim 1 : vector<8x256xf32>, i32 -> vector<8x256xf32>
    %103 = vector.extract_strided_slice %18 {offsets = [6, 0], sizes = [1, 256], strides = [1, 1]} : vector<8x256xf32> to vector<1x256xf32>
    %104 = vector.broadcast %103 : vector<1x256xf32> to vector<8x256xf32>
    %105 = arith.mulf %102, %104 : vector<8x256xf32>
    %c56_49 = arith.constant 56 : index
    %c0_50 = arith.constant 0 : index
    %106 = vector.load %arg7[%c56_49, %c0_50] : memref<73x256xf32, #tpu.memory_space<vmem>>, vector<8x256xf32>
    tpu.vector_store %arg7[%c56_49, %c0_50], %105 {strides = array<i32>} : memref<73x256xf32, #tpu.memory_space<vmem>>, vector<8x256xf32>,
    %c239_i32_51 = arith.constant 239 : i32
    %107 = tpu.dynamic_rotate %70 by %c239_i32_51 dim 1 : vector<8x256xf32>, i32 -> vector<8x256xf32>
    %108 = vector.extract_strided_slice %18 {offsets = [7, 0], sizes = [1, 256], strides = [1, 1]} : vector<8x256xf32> to vector<1x256xf32>
    %109 = vector.broadcast %108 : vector<1x256xf32> to vector<8x256xf32>
    %110 = arith.mulf %107, %109 : vector<8x256xf32>
    %c64_52 = arith.constant 64 : index
    %c0_53 = arith.constant 0 : index
    %111 = vector.load %arg7[%c64_52, %c0_53] : memref<73x256xf32, #tpu.memory_space<vmem>>, vector<8x256xf32>
    tpu.vector_store %arg7[%c64_52, %c0_53], %110 {strides = array<i32>} : memref<73x256xf32, #tpu.memory_space<vmem>>, vector<8x256xf32>,
    %c1 = arith.constant 1 : index
    %c0_54 = arith.constant 0 : index
    %c0_55 = arith.constant 0 : index
    %112 = vector.load %arg5[%c1, %c0_54, %c0_55] : memref<3x8x73xbf16, #tpu.memory_space<vmem>>, vector<1x8x73xbf16>
    %113 = vector.shape_cast %112 : vector<1x8x73xbf16> to vector<8x73xbf16>
    %c0_56 = arith.constant 0 : index
    %c0_57 = arith.constant 0 : index
    %114 = vector.load %arg7[%c0_56, %c0_57] : memref<73x256xf32, #tpu.memory_space<vmem>>, vector<73x256xf32>
    %115 = arith.truncf %114 : vector<73x256xf32> to vector<73x256xbf16>
    %cst_58 = arith.constant dense<0.000000e+00> : vector<8x256xf32>
    %116 = tpu.matmul %113, %115, %cst_58 {dimension_numbers = #tpu.dot_dimension_numbers<[1], [0], [0], [1], [0, 0, 1, 1], [], []>} : vector<8x73xbf16>, vector<73x256xbf16>, vector<8x256xf32> -> vector<8x256xf32>
    %117 = arith.negf %116 : vector<8x256xf32>
    %118 = math.exp %117 : vector<8x256xf32>
    %cst_59 = arith.constant 1.000000e+00 : f32
    %119 = vector.broadcast %cst_59 : f32 to vector<8x256xf32>
    %120 = arith.addf %119, %118 : vector<8x256xf32>
    %121 = arith.divf %119, %120 : vector<8x256xf32>
    %122 = arith.mulf %116, %121 : vector<8x256xf32>
    %c17_i32_60 = arith.constant 17 : i32
    %123 = tpu.dynamic_rotate %122 by %c17_i32_60 dim 1 : vector<8x256xf32>, i32 -> vector<8x256xf32>
    %124 = vector.extract_strided_slice %18 {offsets = [0, 0], sizes = [1, 256], strides = [1, 1]} : vector<8x256xf32> to vector<1x256xf32>
    %125 = vector.broadcast %124 : vector<1x256xf32> to vector<8x256xf32>
    %126 = arith.mulf %123, %125 : vector<8x256xf32>
    %c0_61 = arith.constant 0 : index
    %c0_62 = arith.constant 0 : index
    %127 = vector.load %arg7[%c0_61, %c0_62] : memref<73x256xf32, #tpu.memory_space<vmem>>, vector<8x256xf32>
    tpu.vector_store %arg7[%c0_61, %c0_62], %126 {strides = array<i32>} : memref<73x256xf32, #tpu.memory_space<vmem>>, vector<8x256xf32>,
    %c16_i32_63 = arith.constant 16 : i32
    %128 = tpu.dynamic_rotate %122 by %c16_i32_63 dim 1 : vector<8x256xf32>, i32 -> vector<8x256xf32>
    %129 = vector.extract_strided_slice %18 {offsets = [1, 0], sizes = [1, 256], strides = [1, 1]} : vector<8x256xf32> to vector<1x256xf32>
    %130 = vector.broadcast %129 : vector<1x256xf32> to vector<8x256xf32>
    %131 = arith.mulf %128, %130 : vector<8x256xf32>
    %c8_64 = arith.constant 8 : index
    %c0_65 = arith.constant 0 : index
    %132 = vector.load %arg7[%c8_64, %c0_65] : memref<73x256xf32, #tpu.memory_space<vmem>>, vector<8x256xf32>
    tpu.vector_store %arg7[%c8_64, %c0_65], %131 {strides = array<i32>} : memref<73x256xf32, #tpu.memory_space<vmem>>, vector<8x256xf32>,
    %c15_i32_66 = arith.constant 15 : i32
    %133 = tpu.dynamic_rotate %122 by %c15_i32_66 dim 1 : vector<8x256xf32>, i32 -> vector<8x256xf32>
    %134 = vector.extract_strided_slice %18 {offsets = [2, 0], sizes = [1, 256], strides = [1, 1]} : vector<8x256xf32> to vector<1x256xf32>
    %135 = vector.broadcast %134 : vector<1x256xf32> to vector<8x256xf32>
    %136 = arith.mulf %133, %135 : vector<8x256xf32>
    %c16_67 = arith.constant 16 : index
    %c0_68 = arith.constant 0 : index
    %137 = vector.load %arg7[%c16_67, %c0_68] : memref<73x256xf32, #tpu.memory_space<vmem>>, vector<8x256xf32>
    tpu.vector_store %arg7[%c16_67, %c0_68], %136 {strides = array<i32>} : memref<73x256xf32, #tpu.memory_space<vmem>>, vector<8x256xf32>,
    %c1_i32_69 = arith.constant 1 : i32
    %138 = tpu.dynamic_rotate %122 by %c1_i32_69 dim 1 : vector<8x256xf32>, i32 -> vector<8x256xf32>
    %139 = vector.extract_strided_slice %18 {offsets = [3, 0], sizes = [1, 256], strides = [1, 1]} : vector<8x256xf32> to vector<1x256xf32>
    %140 = vector.broadcast %139 : vector<1x256xf32> to vector<8x256xf32>
    %141 = arith.mulf %138, %140 : vector<8x256xf32>
    %c24_70 = arith.constant 24 : index
    %c0_71 = arith.constant 0 : index
    %142 = vector.load %arg7[%c24_70, %c0_71] : memref<73x256xf32, #tpu.memory_space<vmem>>, vector<8x256xf32>
    tpu.vector_store %arg7[%c24_70, %c0_71], %141 {strides = array<i32>} : memref<73x256xf32, #tpu.memory_space<vmem>>, vector<8x256xf32>,
    %c32_72 = arith.constant 32 : index
    %c0_73 = arith.constant 0 : index
    %143 = vector.load %arg7[%c32_72, %c0_73] : memref<73x256xf32, #tpu.memory_space<vmem>>, vector<8x256xf32>
    tpu.vector_store %arg7[%c32_72, %c0_73], %122 {strides = array<i32>} : memref<73x256xf32, #tpu.memory_space<vmem>>, vector<8x256xf32>,
    %c255_i32_74 = arith.constant 255 : i32
    %144 = tpu.dynamic_rotate %122 by %c255_i32_74 dim 1 : vector<8x256xf32>, i32 -> vector<8x256xf32>
    %145 = vector.extract_strided_slice %18 {offsets = [4, 0], sizes = [1, 256], strides = [1, 1]} : vector<8x256xf32> to vector<1x256xf32>
    %146 = vector.broadcast %145 : vector<1x256xf32> to vector<8x256xf32>
    %147 = arith.mulf %144, %146 : vector<8x256xf32>
    %c40_75 = arith.constant 40 : index
    %c0_76 = arith.constant 0 : index
    %148 = vector.load %arg7[%c40_75, %c0_76] : memref<73x256xf32, #tpu.memory_space<vmem>>, vector<8x256xf32>
    tpu.vector_store %arg7[%c40_75, %c0_76], %147 {strides = array<i32>} : memref<73x256xf32, #tpu.memory_space<vmem>>, vector<8x256xf32>,
    %c241_i32_77 = arith.constant 241 : i32
    %149 = tpu.dynamic_rotate %122 by %c241_i32_77 dim 1 : vector<8x256xf32>, i32 -> vector<8x256xf32>
    %150 = vector.extract_strided_slice %18 {offsets = [5, 0], sizes = [1, 256], strides = [1, 1]} : vector<8x256xf32> to vector<1x256xf32>
    %151 = vector.broadcast %150 : vector<1x256xf32> to vector<8x256xf32>
    %152 = arith.mulf %149, %151 : vector<8x256xf32>
    %c48_78 = arith.constant 48 : index
    %c0_79 = arith.constant 0 : index
    %153 = vector.load %arg7[%c48_78, %c0_79] : memref<73x256xf32, #tpu.memory_space<vmem>>, vector<8x256xf32>
    tpu.vector_store %arg7[%c48_78, %c0_79], %152 {strides = array<i32>} : memref<73x256xf32, #tpu.memory_space<vmem>>, vector<8x256xf32>,
    %c240_i32_80 = arith.constant 240 : i32
    %154 = tpu.dynamic_rotate %122 by %c240_i32_80 dim 1 : vector<8x256xf32>, i32 -> vector<8x256xf32>
    %155 = vector.extract_strided_slice %18 {offsets = [6, 0], sizes = [1, 256], strides = [1, 1]} : vector<8x256xf32> to vector<1x256xf32>
    %156 = vector.broadcast %155 : vector<1x256xf32> to vector<8x256xf32>
    %157 = arith.mulf %154, %156 : vector<8x256xf32>
    %c56_81 = arith.constant 56 : index
    %c0_82 = arith.constant 0 : index
    %158 = vector.load %arg7[%c56_81, %c0_82] : memref<73x256xf32, #tpu.memory_space<vmem>>, vector<8x256xf32>
    tpu.vector_store %arg7[%c56_81, %c0_82], %157 {strides = array<i32>} : memref<73x256xf32, #tpu.memory_space<vmem>>, vector<8x256xf32>,
    %c239_i32_83 = arith.constant 239 : i32
    %159 = tpu.dynamic_rotate %122 by %c239_i32_83 dim 1 : vector<8x256xf32>, i32 -> vector<8x256xf32>
    %160 = vector.extract_strided_slice %18 {offsets = [7, 0], sizes = [1, 256], strides = [1, 1]} : vector<8x256xf32> to vector<1x256xf32>
    %161 = vector.broadcast %160 : vector<1x256xf32> to vector<8x256xf32>
    %162 = arith.mulf %159, %161 : vector<8x256xf32>
    %c64_84 = arith.constant 64 : index
    %c0_85 = arith.constant 0 : index
    %163 = vector.load %arg7[%c64_84, %c0_85] : memref<73x256xf32, #tpu.memory_space<vmem>>, vector<8x256xf32>
    tpu.vector_store %arg7[%c64_84, %c0_85], %162 {strides = array<i32>} : memref<73x256xf32, #tpu.memory_space<vmem>>, vector<8x256xf32>,
    %c2 = arith.constant 2 : index
    %c0_86 = arith.constant 0 : index
    %c0_87 = arith.constant 0 : index
    %164 = vector.load %arg5[%c2, %c0_86, %c0_87] : memref<3x8x73xbf16, #tpu.memory_space<vmem>>, vector<1x8x73xbf16>
    %165 = vector.shape_cast %164 : vector<1x8x73xbf16> to vector<8x73xbf16>
    %c0_88 = arith.constant 0 : index
    %c0_89 = arith.constant 0 : index
    %166 = vector.load %arg7[%c0_88, %c0_89] : memref<73x256xf32, #tpu.memory_space<vmem>>, vector<73x256xf32>
    %167 = arith.truncf %166 : vector<73x256xf32> to vector<73x256xbf16>
    %cst_90 = arith.constant dense<0.000000e+00> : vector<8x256xf32>
    %168 = tpu.matmul %165, %167, %cst_90 {dimension_numbers = #tpu.dot_dimension_numbers<[1], [0], [0], [1], [0, 0, 1, 1], [], []>} : vector<8x73xbf16>, vector<73x256xbf16>, vector<8x256xf32> -> vector<8x256xf32>
    %169 = arith.negf %168 : vector<8x256xf32>
    %170 = math.exp %169 : vector<8x256xf32>
    %cst_91 = arith.constant 1.000000e+00 : f32
    %171 = vector.broadcast %cst_91 : f32 to vector<8x256xf32>
    %172 = arith.addf %171, %170 : vector<8x256xf32>
    %173 = arith.divf %171, %172 : vector<8x256xf32>
    %174 = arith.mulf %168, %173 : vector<8x256xf32>
    %175 = arith.addf %174, %15 : vector<8x256xf32>
    %c0_92 = arith.constant 0 : index
    %c0_93 = arith.constant 0 : index
    %c0_94 = arith.constant 0 : index
    %176 = vector.load %arg6[%c0_92, %c0_93, %c0_94] : memref<1x8x256xf32, #tpu.memory_space<vmem>>, vector<1x8x256xf32>
    %177 = vector.shape_cast %176 : vector<1x8x256xf32> to vector<8x256xf32>
    %178 = vector.shape_cast %175 : vector<8x256xf32> to vector<1x8x256xf32>
    tpu.vector_store %arg6[%c0_92, %c0_93, %c0_94], %178 {strides = array<i32>} : memref<1x8x256xf32, #tpu.memory_space<vmem>>, vector<1x8x256xf32>,
    return
  }
  func.func @transform_0(%arg0: i32) -> (i32, i32, i32) {
    %c0_i32 = arith.constant 0 : i32
    %c0_i32_0 = arith.constant 0 : i32
    %c0_i32_1 = arith.constant 0 : i32
    return %arg0, %c0_i32, %c0_i32_0 : i32, i32, i32
  }
  func.func @transform_1(%arg0: i32) -> (i32, i32) {
    %c0_i32 = arith.constant 0 : i32
    %c0_i32_0 = arith.constant 0 : i32
    %c0_i32_1 = arith.constant 0 : i32
    return %c0_i32, %c0_i32_0 : i32, i32
  }
  func.func @transform_2(%arg0: i32) -> (i32, i32) {
    %c0_i32 = arith.constant 0 : i32
    %c0_i32_0 = arith.constant 0 : i32
    %c0_i32_1 = arith.constant 0 : i32
    return %c0_i32, %c0_i32_0 : i32, i32
  }
  func.func @transform_3(%arg0: i32) -> (i32, i32) {
    %c0_i32 = arith.constant 0 : i32
    %c0_i32_0 = arith.constant 0 : i32
    %c0_i32_1 = arith.constant 0 : i32
    return %c0_i32, %c0_i32_0 : i32, i32
  }
  func.func @transform_4(%arg0: i32) -> (i32, i32, i32) {
    %c0_i32 = arith.constant 0 : i32
    %c0_i32_0 = arith.constant 0 : i32
    %c0_i32_1 = arith.constant 0 : i32
    %c0_i32_2 = arith.constant 0 : i32
    return %c0_i32, %c0_i32_0, %c0_i32_1 : i32, i32, i32
  }
  func.func @transform_5(%arg0: i32) -> (i32, i32, i32) {
    %c0_i32 = arith.constant 0 : i32
    %c0_i32_0 = arith.constant 0 : i32
    %c0_i32_1 = arith.constant 0 : i32
    return %arg0, %c0_i32, %c0_i32_0 : i32, i32, i32
  }
}

</mosaic_0001>

<bundles_post_ra>
// kernel: tpu_custom_call.1
= control target key start
LH: loop header
LB: loop body
LE: loop exit
PB: predicated region body
PF: predicated region fallthrough
CT: control target
= control target key end

     0   :  { %10 = vsyncpa [#allocation4], 0  ;;  %s1813_s0 = inlined_call_operand.vmem [shape: f32[2,4,256], index: 0, kind: input, shape index: {}]   ;;  %s1814_s1 = inlined_call_operand.hbm [shape: f32[8,256], index: 1, kind: input, shape index: {}]   ;;  %s1815_s2 = inlined_call_operand.vmem [shape: bf16[16,4], index: 2, kind: input, shape index: {}]   ;;  %s1816_s3 = inlined_call_operand.vmem [shape: f32[16,1], index: 3, kind: input, shape index: {}]   ;;  %s1817_s4 = inlined_call_operand.vmem [shape: bf16[3,8,73], index: 4, kind: input, shape index: {}]   ;;  %s1818_s5 = inlined_call_operand.hbm [shape: f32[2,8,256], index: 5, kind: output, shape index: {}]  }
   0x1   :  { %11 = vsyncpa [#allocation5], 0 }
   0x2   :  { %13 = vsyncpa [#allocation5 + $0x1], 0  ;;  %s1368_s18 = smov 0   ;;  %s1370_s19 = smov 0  }
   0x3   :  { %s1372_s20 = smov 0   ;;  %s1374_s21 = smov 0  }
   0x4 LB: > { %s1389_s22 = sadd.s32 4294967295, %s1324_s21   ;;  %s1084_s23 = sadd.s32 4294967294, %s1324_s21   ;;  %s1324_s21 = sphi %s1374_s21, %s1835_s21   ;;  %s1320_s20 = sphi %s1372_s20, %s1834_s20   ;;  %s1316_s19 = sphi %s1370_s19, %s1833_s19   ;;  %s1312_s18 = sphi %s1368_s18, %s1832_s18  }
   0x5   : > { %s1393_s24 = sadd.s32 1, %s1324_s21   ;;  %s136_s25 = sadd.s32 1, %s1320_s20 }
   0x6   : > { %s133_s26 = ssub.s32 %s1324_s21, %s1393_s24  ;;  %p146_p0 = scmp.ne.s32.totalorder %s1320_s20, %s1316_s19 }
   0x7   : > { %p134_p1 = scmp.eq.s32.totalorder %s133_s26, 0  ;;  %p147_p2 = scmp.eq.s32.totalorder %s1389_s22, 1 }
   0x8   : > { %p152_p3 = scmp.ne.s32.totalorder %s1316_s19, %s1312_s18  ;;  %p153_p4 = scmp.eq.s32.totalorder %s1084_s23, 1 }
   0x9   : > { %s1404_s27 = scalar_select %p134_p1, %s1320_s20, %s136_s25  }
   0xa   : > { %p1406_p5 = por %p147_p2, %p146_p0  ;;  %p1410_p6 = por %p153_p4, %p152_p3 }
   0xb   : > { %p1085_p7 = scmp.ge.s32.totalorder %s1324_s21, 1  ;;  %p160_p8 = scmp.lt.s32.totalorder %s1324_s21, 3 }
   0xc   : > { %p1139_p9 = scmp.eq.s32.totalorder %s1389_s22, 0  ;;  %s172_s7 = sshll.u32 %s1814_s1, 4  ;;  %s173_s7 = int_to_ptr.hbm [resolvable:$true] %s172_s7 }
   0xd   : > { %p161_p10 = pnand %p1085_p7, %p160_p8  ;;  %s1326_s8 = smov [#allocation3]  }
   0xe   : > { %s174_s9 = sshll.u32 %s1326_s8, 4  ;;  %s175_s9 = int_to_ptr.vmem [resolvable:$true] %s174_s9 }
   0xf   : > { %p1131_p11 = pneg %p161_p10  ;;  %204 = sbr.rel (%p161_p10) target bundleno = 1169 (0x491), region = 40 }
  0x11   : > { %p1132_p12 = pnand %p1139_p9, %p1131_p11 }
  0x13   : > { %1134 = dma.hbm_to_vmem [thread:$0]  (!%p1132_p12), %s173_s7, 256, %s175_s9, [#allocation4]  }
  0x14   : > { %1303 = dma.done.wait (%p1139_p9), [#allocation4], 256  }
  0x15   : > { %1305 = vsyncadd (%p1139_p9), [#allocation4], 4294967040  ;;  %p233_p13 = scmp.lt.s32.totalorder %s1389_s22, 1  ;;  %v1327_v0 = vmov 0   ;;  %v250_v2 = vld [vmem:[%s1816_s3] sm:$0xff]  ;;  %vm271_vm0 = vcmask 1041408   ;;  %v386_v43 = vlaneseq }
  0x16   : > { %1186 = vset.pattern.permute.xlu0 %v1327_v0  ;;  %1187 = vset.pattern.permute.xlu1 %v1327_v0  ;;  %v1123_v9 = vld [vmem:[%s1815_s2] sm:$0xff]  ;;  %vm267_vm1 = vcmask 31744   ;;  %s1328_s25 = smov 111   ;;  %s1329_s26 = smov 113   ;;  %v1336_v44 = vmov 1.0   ;;  %v1469_v47 = vld [vmem:[#allocation3] sm:$0xff] }
  0x17   : > { %s234_s10 = scalar_select %p233_p13, %s1389_s22, 1  ;;  %254 = vperm.xlu0 %1186, %v250_v2   ;;  %vm388_vm10 = vcmp.lt.s32.totalorder %v386_v43, 256  ;;  %v1467_v46 = vand.u32 127, %v386_v43  ;;  %v1471_v48 = vld [vmem:[#allocation3 + $0x8] sm:$0xff]  ;;  %vm538_vm11 = vcmask 1043456   ;;  %v1475_v49 = vperm.slane %v1469_v47, 7 }
  0x18   : > { %s1330_s30 = smov 112   ;;  %s1331_s6 = smov 15   ;;  %391 = vst.msk [vmem:[#allocation2 + $0x90] ss:$8 sm:$0x3] %vm388_vm10, %v1336_v44  ;;  %v1478_v50 = vperm.slane %v1471_v48, 7 }
  0x19   : > { %s1122_s11 = sshll.u32 %s234_s10, 3  ;;  %s1332_s7 = smov 127   ;;  %vm494_vm12 = vcmp.lt.s32.totalorder %v1467_v46, 111  ;;  %vm539_vm13 = vcmask 1044480   ;;  %v1337_v53 = vmov 65535   ;;  %vm468_vm14 = vcmp.lt.s32.totalorder %v1467_v46, 113 }
  0x1a   : > { %s237_s14 = scalar_lea.vmem %s1813_s0, %s1122_s11  ;;  %s1333_s8 = smov 1   ;;  %v540_v54 = vsel %vm538_vm11, 4294967295, %v1337_v53  ;;  %vm481_vm15 = vcmp.lt.s32.totalorder %v1467_v46, 112  ;;  %v1494_v2 = vperm.slane %v1471_v48, 6  ;;  %v1559_v53 = vperm.slane %v1469_v47, 0 }
  0x1b   : > { %v239_v1 = vld [vmem:[%s237_s14] sm:$0xff]  ;;  %s1334_s9 = smov 16   ;;  %s1335_s10 = smov 17   ;;  %v1486_v62 = vsel %vm539_vm13, %v540_v54, 0 }
  0x1c   : > { %243 = vst [vmem:[#allocation1] ss:$2 sm:$0xff] %v239_v1  ;;  %v1491_v1 = vperm.slane %v1469_v47, 6  ;;  %s1278_s16 = scalar_lea.hbm %s1818_s5, 32 }
  0x1f   : > { %v522_v57 = vld [vmem:[#allocation2 + $0x90] sm:$0x1]  ;;  %v523_v58 = vld [vmem:[#allocation2 + $0x98] sm:$0x1] }
  0x23   : > { %v244_v3 = vld.sshfl [vmem:[#allocation1] sm:$0xff pattern:$0x75316420]  ;;  %v245_v4 = vld.sshfl [vmem:[#allocation1 + $0x8] sm:$0xff pattern:$0x75316420] }
  0x24   : > { %v248_v5 = vpack.c.bf16 %v244_v3, %v244_v3  ;;  %v249_v6 = vpack.c.bf16 %v245_v4, %v245_v4  ;;  %v1497_v3 = vperm.slane %v1469_v47, 5  ;;  %v1500_v4 = vperm.slane %v1471_v48, 5 }
  0x26   : > { %v273_v7 = vsel %vm271_vm0, %v248_v5, 0  ;;  %v276_v8 = vsel %vm271_vm0, %v249_v6, 0  ;;  %vm455_vm0 = vcmp.lt.s32.totalorder %v1467_v46, 127 }
  0x27   : > { %285 = vmatpush.bf16.msra.mxu0 %v273_v7  ;;  %299 = vmatpush.bf16.msra.mxu1 %v276_v8 }
  0x2a   : > { %1097 = vmatmul.msk.bf16.vlgmr.msra.gmra.mxu0 %vm267_vm1, %v1123_v9  ;;  %1098 = vmatmul.msk.bf16.vlgmr.msra.gmra.mxu1 %vm267_vm1, %v1123_v9  ;;  %vm440_vm1 = vcmp.lt.s32.totalorder %v1467_v46, 1 }
  0x89   : > { %v255_v10 = vpop.permute.xlu0 %254 }
  0xa7   : > { %v287_v11 = vpop.f32.mrf.mxu0  ;;  %v301_v12 = vpop.f32.mrf.mxu1 }
  0xa8   : > { %v288_v13 = vadd.f32 %v287_v11, %v255_v10  ;;  %v302_v14 = vadd.f32 %v301_v12, %v255_v10 }
  0xaa   : > { %v1099_v15 = vmul.f32 -1.442695, %v288_v13  ;;  %v1100_v16 = vmul.f32 -1.442695, %v302_v14 }
  0xac   : > { %1188 = vpow2.f32 %v1099_v15 }
  0xad   : > { %1190 = vpow2.f32 %v1100_v16 }
  0xb2   : > { %v1189_v17 = vpop.eup %1188 }
  0xb3   : > { %v1191_v18 = vpop.eup %1190  ;;  %v318_v19 = vadd.f32 1.0, %v1189_v17 }
  0xb4   : > { %v319_v20 = vadd.f32 1.0, %v1191_v18 }
  0xb5   : > { %1192 = vrcp.f32 %v318_v19  ;;  %v333_v26 = vand.u32 2147483648, %v318_v19  ;;  %v331_v29 = vand.u32 2147483647, %v318_v19  ;;  %vm327_vm4 = vweird.f32 %v318_v19 }
  0xb6   : > { %1194 = vrcp.f32 %v319_v20  ;;  %v348_v30 = vand.u32 2147483648, %v319_v20  ;;  %v346_v32 = vand.u32 2147483647, %v319_v20  ;;  %vm342_vm6 = vweird.f32 %v319_v20 }
  0xb7   : > { %v334_v34 = vor.u32 1.1754944e-38, %v333_v26  ;;  %vm332_vm7 = vcmp.eq.f32.partialorder %v331_v29, 8.507059e+37 }
  0xb8   : > { %v349_v37 = vor.u32 1.1754944e-38, %v348_v30  ;;  %vm347_vm9 = vcmp.eq.f32.partialorder %v346_v32, 8.507059e+37  ;;  %v1533_v30 = vperm.slane %v1469_v47, 3  ;;  %v1540_v32 = vperm.slane %v1469_v47, 2 }
  0xbb   : > { %v1193_v21 = vpop.eup %1192 }
  0xbc   : > { %v1195_v22 = vpop.eup %1194  ;;  %v323_v23 = vmul.f32 %v1193_v21, %v318_v19  ;;  %vm328_vm2 = vweird.f32 %v1193_v21 }
  0xbd   : > { %v338_v24 = vmul.f32 %v1195_v22, %v319_v20  ;;  %vm343_vm3 = vweird.f32 %v1195_v22  ;;  %vm329_vm5 = vmor %vm327_vm4, %vm328_vm2  ;;  %v1518_v20 = vperm.slane %v1469_v47, 4  ;;  %vm427_vm2 = vcmp.lt.s32.totalorder %v1467_v46, 15 }
  0xbe   : > { %v324_v25 = vsub.f32 1.0, %v323_v23  ;;  %vm344_vm8 = vmor %vm342_vm6, %vm343_vm3  ;;  %vm401_vm3 = vcmp.lt.s32.totalorder %v1467_v46, 17  ;;  %vm414_vm4 = vcmp.lt.s32.totalorder %v1467_v46, 16 }
  0xbf   : > { %v339_v27 = vsub.f32 1.0, %v338_v24 }
  0xc0   : > { %v325_v28 = vmul.f32 %v1193_v21, %v324_v25 }
  0xc1   : > { %v340_v31 = vmul.f32 %v1195_v22, %v339_v27 }
  0xc2   : > { %v326_v33 = vadd.f32 %v1193_v21, %v325_v28 }
  0xc3   : > { %v341_v35 = vadd.f32 %v1195_v22, %v340_v31  ;;  %v1536_v31 = vperm.slane %v1471_v48, 3 }
  0xc4   : > { %v330_v36 = vsel %vm329_vm5, %v1193_v21, %v326_v33  ;;  %v1521_v21 = vperm.slane %v1471_v48, 4  ;;  %v1543_v33 = vperm.slane %v1471_v48, 2  ;;  %vm1819_vm5 = vcmask 596992  }
  0xc5   : > { %v335_v38 = vsel %vm332_vm7, %v334_v34, %v330_v36  ;;  %v345_v39 = vsel %vm344_vm8, %v1195_v22, %v341_v35 }
  0xc6   : > { %v1431_v40 = vmul.f32 %v335_v38, %v288_v13  ;;  %v350_v41 = vsel %vm347_vm9, %v349_v37, %v345_v39 }
  0xc7   : > { %v1433_v42 = vmul.f32 %v350_v41, %v302_v14 }
  0xc8   : > { %490 = vrot.lane.b32.xlu0 %v1431_v40, %s1328_s25 }
  0xc9   : > { %466 = vrot.lane.b32.xlu2 %v1433_v42, %s1329_s26  ;;  %492 = vrot.lane.b32.xlu1 %v1433_v42, %s1328_s25 }
  0xd0   : > { %479 = vrot.lane.b32.xlu0 %v1433_v42, %s1330_s30 }
  0xd1   : > { %477 = vrot.lane.b32.xlu2 %v1431_v40, %s1330_s30  ;;  %464 = vrot.lane.b32.xlu1 %v1431_v40, %s1329_s26 }
  0xd8   : > { %423 = vrot.lane.b32.xlu0 %v1431_v40, %s1331_s6 }
  0xd9   : > { %453 = vrot.lane.b32.xlu2 %v1433_v42, %s1332_s7  ;;  %451 = vrot.lane.b32.xlu1 %v1431_v40, %s1332_s7 }
  0xe0   : > { %438 = vrot.lane.b32.xlu0 %v1433_v42, %s1333_s8 }
  0xe1   : > { %436 = vrot.lane.b32.xlu2 %v1431_v40, %s1333_s8  ;;  %425 = vrot.lane.b32.xlu1 %v1433_v42, %s1331_s6 }
  0xe8   : > { %410 = vrot.lane.b32.xlu0 %v1431_v40, %s1334_s9 }
  0xe9   : > { %397 = vrot.lane.b32.xlu2 %v1433_v42, %s1335_s10  ;;  %395 = vrot.lane.b32.xlu1 %v1431_v40, %s1335_s10 }
  0xf1   : > { %412 = vrot.lane.b32.xlu1 %v1433_v42, %s1334_s9 }
 0x123   : > { %v467_v45 = vpop.permute.xlu2 %466 }
 0x12b   : > { %v478_v61 = vpop.permute.xlu2 %477 }
 0x133   : > { %v454_v19 = vpop.permute.xlu2 %453 }
 0x13a   : > { %v491_v51 = vpop.permute.xlu0 %490 }
 0x13b   : > { %v493_v52 = vpop.permute.xlu1 %492  ;;  %v437_v34 = vpop.permute.xlu2 %436 }
 0x13c   : > { %v495_v55 = vsel %vm494_vm12, %v491_v51, %v493_v52  ;;  %v496_v56 = vsel %vm494_vm12, %v493_v52, %v491_v51 }
 0x13d   : > { %v499_v59 = vmul.f32 %v1475_v49, %v495_v55  ;;  %v500_v60 = vmul.f32 %v1478_v50, %v496_v56  ;;  %v1562_v55 = vperm.slane %v1471_v48, 0  ;;  %v1566_v56 = vperm.slane %v1469_v47, 1 }
 0x13f   : > { %v532_v63 = vpack.c.bf16 %v522_v57, %v499_v59  ;;  %v533_v0 = vpack.c.bf16 %v523_v58, %v500_v60  ;;  %v1569_v57 = vperm.slane %v1471_v48, 1 }
 0x141   : > { %v543_v5 = vand.u32 %v1486_v62, %v532_v63  ;;  %v546_v6 = vand.u32 %v1486_v62, %v533_v0 }
 0x142   : > { %v480_v7 = vpop.permute.xlu0 %479 }
 0x143   : > { %v465_v8 = vpop.permute.xlu1 %464  ;;  %v482_v9 = vsel %vm481_vm15, %v478_v61, %v480_v7  ;;  %v483_v10 = vsel %vm481_vm15, %v480_v7, %v478_v61  ;;  %551 = vmatpush.bf16.msra.mxu2 %v543_v5  ;;  %564 = vmatpush.bf16.msra.mxu3 %v546_v6  ;;  %v398_v54 = vpop.permute.xlu2 %397 }
 0x144   : > { %v469_v11 = vsel %vm468_vm14, %v465_v8, %v467_v45  ;;  %v470_v12 = vsel %vm468_vm14, %v467_v45, %v465_v8  ;;  %v486_v13 = vmul.f32 %v1491_v1, %v482_v9  ;;  %v487_v14 = vmul.f32 %v1494_v2, %v483_v10  ;;  %v503_v9 = vld [vmem:[%s1817_s4] sm:$0xf] }
 0x145   : > { %v473_v15 = vmul.f32 %v1497_v3, %v469_v11  ;;  %v474_v16 = vmul.f32 %v1500_v4, %v470_v12 }
 0x147   : > { %v530_v17 = vpack.c.bf16 %v486_v13, %v473_v15  ;;  %v531_v18 = vpack.c.bf16 %v487_v14, %v474_v16 }
 0x149   : > { %552 = vmatpush.bf16.msra.mxu2 %v530_v17  ;;  %565 = vmatpush.bf16.msra.mxu3 %v531_v18 }
 0x14a   : > { %v424_v22 = vpop.permute.xlu0 %423 }
 0x14b   : > { %v452_v23 = vpop.permute.xlu1 %451 }
 0x14c   : > { %v456_v24 = vsel %vm455_vm0, %v452_v23, %v454_v19  ;;  %v457_v25 = vsel %vm455_vm0, %v454_v19, %v452_v23 }
 0x14d   : > { %v460_v26 = vmul.f32 %v1518_v20, %v456_v24  ;;  %v461_v27 = vmul.f32 %v1521_v21, %v457_v25 }
 0x14f   : > { %v528_v28 = vpack.c.bf16 %v460_v26, %v1431_v40  ;;  %v529_v29 = vpack.c.bf16 %v461_v27, %v1433_v42 }
 0x151   : > { %553 = vmatpush.bf16.msra.mxu2 %v528_v28  ;;  %566 = vmatpush.bf16.msra.mxu3 %v529_v29 }
 0x152   : > { %v439_v35 = vpop.permute.xlu0 %438 }
 0x153   : > { %v426_v36 = vpop.permute.xlu1 %425  ;;  %v441_v37 = vsel %vm440_vm1, %v437_v34, %v439_v35  ;;  %v442_v38 = vsel %vm440_vm1, %v439_v35, %v437_v34 }
 0x154   : > { %v428_v39 = vsel %vm427_vm2, %v424_v22, %v426_v36  ;;  %v429_v40 = vsel %vm427_vm2, %v426_v36, %v424_v22  ;;  %v445_v41 = vmul.f32 %v1533_v30, %v442_v38  ;;  %v446_v42 = vmul.f32 %v1536_v31, %v441_v37 }
 0x155   : > { %v432_v43 = vmul.f32 %v1540_v32, %v429_v40  ;;  %v433_v44 = vmul.f32 %v1543_v33, %v428_v39 }
 0x157   : > { %v526_v45 = vpack.c.bf16 %v445_v41, %v432_v43  ;;  %v527_v51 = vpack.c.bf16 %v446_v42, %v433_v44 }
 0x159   : > { %554 = vmatpush.bf16.msra.mxu2 %v526_v45  ;;  %567 = vmatpush.bf16.msra.mxu3 %v527_v51 }
 0x15a   : > { %v411_v60 = vpop.permute.xlu0 %410 }
 0x15b   : > { %v396_v52 = vpop.permute.xlu1 %395 }
 0x15c   : > { %v402_v58 = vsel %vm401_vm3, %v396_v52, %v398_v54  ;;  %v403_v59 = vsel %vm401_vm3, %v398_v54, %v396_v52 }
 0x15d   : > { %v406_v47 = vmul.f32 %v1559_v53, %v403_v59  ;;  %v407_v5 = vmul.f32 %v1562_v55, %v402_v58 }
 0x163   : > { %v413_v61 = vpop.permute.xlu1 %412 }
 0x164   : > { %v415_v63 = vsel %vm414_vm4, %v411_v60, %v413_v61  ;;  %v416_v0 = vsel %vm414_vm4, %v413_v61, %v411_v60 }
 0x165   : > { %v419_v48 = vmul.f32 %v1566_v56, %v416_v0  ;;  %v420_v6 = vmul.f32 %v1569_v57, %v415_v63 }
 0x167   : > { %v524_v7 = vpack.c.bf16 %v419_v48, %v406_v47  ;;  %v525_v8 = vpack.c.bf16 %v420_v6, %v407_v5  ;;  %v716_v47 = vld [vmem:[#allocation2 + $0x90] sm:$0x1]  ;;  %v717_v5 = vld [vmem:[#allocation2 + $0x98] sm:$0x1] }
 0x169   : > { %555 = vmatpush.bf16.msra.mxu2 %v524_v7  ;;  %568 = vmatpush.bf16.msra.mxu3 %v525_v8 }
 0x16c   : > { %1103 = vmatmul.msk.bf16.vlgmr.msra.gmra.mxu2 %vm1819_vm5, %v503_v9  ;;  %1104 = vmatmul.msk.bf16.vlgmr.msra.gmra.mxu3 %vm1819_vm5, %v503_v9 }
 0x1ef   : > { %v557_v10 = vpop.f32.mrf.mxu2  ;;  %v570_v11 = vpop.f32.mrf.mxu3 }
 0x1f0   : > { %v1105_v12 = vmul.f32 -1.442695, %v557_v10  ;;  %v1106_v13 = vmul.f32 -1.442695, %v570_v11 }
 0x1f2   : > { %1196 = vpow2.f32 %v1105_v12 }
 0x1f3   : > { %1198 = vpow2.f32 %v1106_v13 }
 0x1f7   : > { %v559_v14 = vpop.f32.mrf.mxu2  ;;  %v572_v15 = vpop.f32.mrf.mxu3 }
 0x1f8   : > { %v1197_v16 = vpop.eup %1196 }
 0x1f9   : > { %v1199_v17 = vpop.eup %1198  ;;  %v580_v18 = vadd.f32 1.0, %v1197_v16 }
 0x1fa   : > { %v581_v19 = vadd.f32 1.0, %v1199_v17 }
 0x1fb   : > { %1200 = vrcp.f32 %v580_v18  ;;  %v593_v27 = vand.u32 2147483648, %v580_v18  ;;  %v591_v34 = vand.u32 2147483647, %v580_v18  ;;  %vm587_vm8 = vweird.f32 %v580_v18 }
 0x1fc   : > { %1202 = vrcp.f32 %v581_v19  ;;  %v608_v35 = vand.u32 2147483648, %v581_v19  ;;  %v606_v37 = vand.u32 2147483647, %v581_v19  ;;  %vm602_vm10 = vweird.f32 %v581_v19 }
 0x1fd   : > { %v594_v39 = vor.u32 1.1754944e-38, %v593_v27  ;;  %vm592_vm11 = vcmp.eq.f32.partialorder %v591_v34, 8.507059e+37 }
 0x1fe   : > { %v609_v42 = vor.u32 1.1754944e-38, %v608_v35  ;;  %vm607_vm5 = vcmp.eq.f32.partialorder %v606_v37, 8.507059e+37 }
 0x201   : > { %v1201_v22 = vpop.eup %1200 }
 0x202   : > { %v1203_v23 = vpop.eup %1202  ;;  %v583_v24 = vmul.f32 %v1201_v22, %v580_v18  ;;  %vm588_vm6 = vweird.f32 %v1201_v22 }
 0x203   : > { %v598_v25 = vmul.f32 %v1203_v23, %v581_v19  ;;  %vm603_vm7 = vweird.f32 %v1203_v23  ;;  %vm589_vm9 = vmor %vm587_vm8, %vm588_vm6 }
 0x204   : > { %v584_v26 = vsub.f32 1.0, %v583_v24  ;;  %vm604_vm13 = vmor %vm602_vm10, %vm603_vm7 }
 0x205   : > { %v599_v28 = vsub.f32 1.0, %v598_v25 }
 0x206   : > { %v585_v29 = vmul.f32 %v1201_v22, %v584_v26 }
 0x207   : > { %v600_v36 = vmul.f32 %v1203_v23, %v599_v28 }
 0x208   : > { %v586_v38 = vadd.f32 %v1201_v22, %v585_v29 }
 0x209   : > { %v601_v40 = vadd.f32 %v1203_v23, %v600_v36 }
 0x20a   : > { %v590_v41 = vsel %vm589_vm9, %v1201_v22, %v586_v38 }
 0x20b   : > { %v595_v43 = vsel %vm592_vm11, %v594_v39, %v590_v41  ;;  %v605_v44 = vsel %vm604_vm13, %v1203_v23, %v601_v40 }
 0x20c   : > { %v612_v45 = vmul.f32 %v595_v43, %v557_v10  ;;  %v610_v51 = vsel %vm607_vm5, %v609_v42, %v605_v44  ;;  %vm1822_vm5 = vcmask 596992  }
 0x20d   : > { %v613_v52 = vmul.f32 %v610_v51, %v570_v11  ;;  %vm1823_vm6 = vmmov %vm1822_vm5 }
 0x20e   : > { %666 = vrot.lane.b32.xlu1 %v612_v45, %s1329_s26  ;;  %686 = vrot.lane.b32.xlu2 %v612_v45, %s1328_s25 }
 0x20f   : > { %688 = vrot.lane.b32.xlu0 %v613_v52, %s1328_s25 }
 0x216   : > { %678 = vrot.lane.b32.xlu1 %v613_v52, %s1330_s30  ;;  %668 = vrot.lane.b32.xlu2 %v613_v52, %s1329_s26 }
 0x217   : > { %676 = vrot.lane.b32.xlu0 %v612_v45, %s1330_s30 }
 0x21e   : > { %634 = vrot.lane.b32.xlu1 %v612_v45, %s1331_s6  ;;  %656 = vrot.lane.b32.xlu2 %v612_v45, %s1332_s7 }
 0x21f   : > { %658 = vrot.lane.b32.xlu0 %v613_v52, %s1332_s7 }
 0x226   : > { %646 = vrot.lane.b32.xlu1 %v613_v52, %s1333_s8  ;;  %636 = vrot.lane.b32.xlu2 %v613_v52, %s1331_s6 }
 0x227   : > { %644 = vrot.lane.b32.xlu0 %v612_v45, %s1333_s8 }
 0x22e   : > { %624 = vrot.lane.b32.xlu1 %v612_v45, %s1334_s9  ;;  %614 = vrot.lane.b32.xlu2 %v612_v45, %s1335_s10 }
 0x22f   : > { %616 = vrot.lane.b32.xlu0 %v613_v52, %s1335_s10 }
 0x236   : > { %626 = vrot.lane.b32.xlu2 %v613_v52, %s1334_s9 }
 0x268   : > { %v687_v54 = vpop.permute.xlu2 %686 }
 0x270   : > { %v669_v58 = vpop.permute.xlu2 %668 }
 0x278   : > { %v657_v61 = vpop.permute.xlu2 %656 }
 0x280   : > { %v667_v59 = vpop.permute.xlu1 %666  ;;  %v637_v23 = vpop.permute.xlu2 %636 }
 0x281   : > { %v689_v60 = vpop.permute.xlu0 %688  ;;  %v670_v11 = vsel %vm468_vm14, %v667_v59, %v669_v58  ;;  %v671_v12 = vsel %vm468_vm14, %v669_v58, %v667_v59 }
 0x282   : > { %v690_v63 = vsel %vm494_vm12, %v687_v54, %v689_v60  ;;  %v691_v0 = vsel %vm494_vm12, %v689_v60, %v687_v54  ;;  %v672_v17 = vmul.f32 %v670_v11, %v1497_v3  ;;  %v673_v18 = vmul.f32 %v671_v12, %v1500_v4  ;;  %v1107_v12 = vld [vmem:[%s1817_s4 + $0x4] sm:$0xf] }
 0x283   : > { %v692_v48 = vmul.f32 %v690_v63, %v1475_v49  ;;  %v693_v6 = vmul.f32 %v691_v0, %v1478_v50 }
 0x285   : > { %v726_v7 = vpack.c.bf16 %v716_v47, %v692_v48  ;;  %v727_v8 = vpack.c.bf16 %v717_v5, %v693_v6 }
 0x287   : > { %v732_v9 = vand.u32 %v726_v7, %v1486_v62  ;;  %v735_v10 = vand.u32 %v727_v8, %v1486_v62 }
 0x288   : > { %v679_v13 = vpop.permute.xlu1 %678  ;;  %v615_v38 = vpop.permute.xlu2 %614 }
 0x289   : > { %v677_v14 = vpop.permute.xlu0 %676  ;;  %740 = vmatpush.bf16.msrb.mxu0 %v732_v9  ;;  %753 = vmatpush.bf16.msrb.mxu1 %v735_v10 }
 0x28a   : > { %v680_v15 = vsel %vm481_vm15, %v677_v14, %v679_v13  ;;  %v681_v16 = vsel %vm481_vm15, %v679_v13, %v677_v14  ;;  %v1659_v13 = vpop.f32.mrf.mxu0  ;;  %v1661_v14 = vpop.f32.mrf.mxu1 }
 0x28b   : > { %v682_v19 = vmul.f32 %v680_v15, %v1491_v1  ;;  %v683_v22 = vmul.f32 %v681_v16, %v1494_v2 }
 0x28d   : > { %v724_v24 = vpack.c.bf16 %v682_v19, %v672_v17  ;;  %v725_v25 = vpack.c.bf16 %v683_v22, %v673_v18 }
 0x28f   : > { %741 = vmatpush.bf16.msrb.mxu0 %v724_v24  ;;  %754 = vmatpush.bf16.msrb.mxu1 %v725_v25 }
 0x290   : > { %v635_v26 = vpop.permute.xlu1 %634  ;;  %v627_v60 = vpop.permute.xlu2 %626 }
 0x291   : > { %v659_v27 = vpop.permute.xlu0 %658  ;;  %v638_v39 = vsel %vm427_vm2, %v635_v26, %v637_v23  ;;  %v639_v40 = vsel %vm427_vm2, %v637_v23, %v635_v26 }
 0x292   : > { %v660_v28 = vsel %vm455_vm0, %v657_v61, %v659_v27  ;;  %v661_v29 = vsel %vm455_vm0, %v659_v27, %v657_v61  ;;  %v641_v51 = vmul.f32 %v638_v39, %v1543_v33 }
 0x293   : > { %v662_v34 = vmul.f32 %v660_v28, %v1518_v20  ;;  %v663_v35 = vmul.f32 %v661_v29, %v1521_v21 }
 0x295   : > { %v722_v36 = vpack.c.bf16 %v662_v34, %v612_v45  ;;  %v723_v37 = vpack.c.bf16 %v663_v35, %v613_v52  ;;  %v640_v45 = vmul.f32 %v639_v40, %v1540_v32 }
 0x297   : > { %742 = vmatpush.bf16.msrb.mxu0 %v722_v36  ;;  %755 = vmatpush.bf16.msrb.mxu1 %v723_v37 }
 0x298   : > { %v647_v41 = vpop.permute.xlu1 %646 }
 0x299   : > { %v645_v42 = vpop.permute.xlu0 %644 }
 0x29a   : > { %v648_v43 = vsel %vm440_vm1, %v645_v42, %v647_v41  ;;  %v649_v44 = vsel %vm440_vm1, %v647_v41, %v645_v42 }
 0x29b   : > { %v650_v52 = vmul.f32 %v649_v44, %v1533_v30  ;;  %v651_v54 = vmul.f32 %v648_v43, %v1536_v31 }
 0x29d   : > { %v720_v58 = vpack.c.bf16 %v650_v52, %v640_v45  ;;  %v721_v59 = vpack.c.bf16 %v651_v54, %v641_v51 }
 0x29f   : > { %743 = vmatpush.bf16.msrb.mxu0 %v720_v58  ;;  %756 = vmatpush.bf16.msrb.mxu1 %v721_v59 }
 0x2a0   : > { %v625_v61 = vpop.permute.xlu1 %624 }
 0x2a1   : > { %v617_v63 = vpop.permute.xlu0 %616  ;;  %v628_v0 = vsel %vm414_vm4, %v625_v61, %v627_v60  ;;  %v629_v47 = vsel %vm414_vm4, %v627_v60, %v625_v61 }
 0x2a2   : > { %v618_v5 = vsel %vm401_vm3, %v615_v38, %v617_v63  ;;  %v619_v48 = vsel %vm401_vm3, %v617_v63, %v615_v38  ;;  %v630_v6 = vmul.f32 %v629_v47, %v1566_v56  ;;  %v631_v7 = vmul.f32 %v628_v0, %v1569_v57  ;;  %v251_v63 = vld [vmem:[%s1816_s3 + $0x8] sm:$0xff] }
 0x2a3   : > { %v620_v8 = vmul.f32 %v619_v48, %v1559_v53  ;;  %v621_v9 = vmul.f32 %v618_v5, %v1562_v55 }
 0x2a5   : > { %v718_v10 = vpack.c.bf16 %v630_v6, %v620_v8  ;;  %v719_v11 = vpack.c.bf16 %v631_v7, %v621_v9  ;;  %v905_v7 = vld [vmem:[#allocation2 + $0x90] sm:$0x1]  ;;  %v906_v8 = vld [vmem:[#allocation2 + $0x98] sm:$0x1] }
 0x2a7   : > { %744 = vmatpush.bf16.msrb.mxu0 %v718_v10  ;;  %757 = vmatpush.bf16.msrb.mxu1 %v719_v11 }
 0x2aa   : > { %1108 = vmatmul.msk.bf16.vlgmr.msrb.gmra.mxu0 %vm1822_vm5, %v1107_v12  ;;  %1109 = vmatmul.msk.bf16.vlgmr.msrb.gmra.mxu1 %vm1823_vm6, %v1107_v12 }
 0x327   : > { %v746_v15 = vpop.f32.mrf.mxu0  ;;  %v759_v16 = vpop.f32.mrf.mxu1 }
 0x328   : > { %v1110_v17 = vmul.f32 -1.442695, %v746_v15  ;;  %v1111_v18 = vmul.f32 -1.442695, %v759_v16 }
 0x32a   : > { %1204 = vpow2.f32 %v1110_v17 }
 0x32b   : > { %1206 = vpow2.f32 %v1111_v18 }
 0x32f   : > { %v748_v19 = vpop.f32.mrf.mxu0  ;;  %v761_v22 = vpop.f32.mrf.mxu1 }
 0x330   : > { %v1205_v23 = vpop.eup %1204 }
 0x331   : > { %v1207_v24 = vpop.eup %1206  ;;  %v769_v25 = vadd.f32 1.0, %v1205_v23 }
 0x332   : > { %v770_v26 = vadd.f32 1.0, %v1207_v24 }
 0x333   : > { %1208 = vrcp.f32 %v769_v25  ;;  %v782_v36 = vand.u32 2147483648, %v769_v25  ;;  %v780_v39 = vand.u32 2147483647, %v769_v25  ;;  %vm776_vm10 = vweird.f32 %v769_v25 }
 0x334   : > { %1210 = vrcp.f32 %v770_v26  ;;  %v797_v40 = vand.u32 2147483648, %v770_v26  ;;  %vm791_vm8 = vweird.f32 %v770_v26  ;;  %v795_v42 = vand.u32 2147483647, %v770_v26 }
 0x335   : > { %v783_v44 = vor.u32 1.1754944e-38, %v782_v36  ;;  %vm781_vm13 = vcmp.eq.f32.partialorder %v780_v39, 8.507059e+37 }
 0x336   : > { %v798_v52 = vor.u32 1.1754944e-38, %v797_v40  ;;  %vm796_vm6 = vcmp.eq.f32.partialorder %v795_v42, 8.507059e+37 }
 0x339   : > { %v1209_v27 = vpop.eup %1208 }
 0x33a   : > { %v1211_v28 = vpop.eup %1210  ;;  %v772_v29 = vmul.f32 %v1209_v27, %v769_v25  ;;  %vm777_vm7 = vweird.f32 %v1209_v27 }
 0x33b   : > { %v787_v34 = vmul.f32 %v1211_v28, %v770_v26  ;;  %vm792_vm9 = vweird.f32 %v1211_v28  ;;  %vm778_vm11 = vmor %vm776_vm10, %vm777_vm7 }
 0x33c   : > { %v773_v35 = vsub.f32 1.0, %v772_v29  ;;  %vm793_vm5 = vmor %vm791_vm8, %vm792_vm9 }
 0x33d   : > { %v788_v37 = vsub.f32 1.0, %v787_v34 }
 0x33e   : > { %v774_v38 = vmul.f32 %v1209_v27, %v773_v35 }
 0x33f   : > { %v789_v41 = vmul.f32 %v1211_v28, %v788_v37 }
 0x340   : > { %v775_v43 = vadd.f32 %v1209_v27, %v774_v38 }
 0x341   : > { %v790_v45 = vadd.f32 %v1211_v28, %v789_v41 }
 0x342   : > { %v779_v51 = vsel %vm778_vm11, %v1209_v27, %v775_v43 }
 0x343   : > { %v784_v54 = vsel %vm781_vm13, %v783_v44, %v779_v51  ;;  %v794_v58 = vsel %vm793_vm5, %v1211_v28, %v790_v45 }
 0x344   : > { %v801_v59 = vmul.f32 %v784_v54, %v746_v15  ;;  %v799_v60 = vsel %vm796_vm6, %v798_v52, %v794_v58 }
 0x345   : > { %v802_v61 = vmul.f32 %v799_v60, %v759_v16 }
 0x346   : > { %855 = vrot.lane.b32.xlu2 %v801_v59, %s1329_s26  ;;  %875 = vrot.lane.b32.xlu0 %v801_v59, %s1328_s25 }
 0x347   : > { %877 = vrot.lane.b32.xlu1 %v802_v61, %s1328_s25  ;;  %s230_s25 = sand.u32 1, %s1316_s19  }
 0x348   : > { %s997_s11 = scalar_lea.sflag [#allocation5], %s230_s25 }
 0x34e   : > { %867 = vrot.lane.b32.xlu2 %v802_v61, %s1330_s30  ;;  %857 = vrot.lane.b32.xlu0 %v802_v61, %s1329_s26  ;;  %s1768_s26 = sshll.u32 %s230_s25, 4 }
 0x34f   : > { %865 = vrot.lane.b32.xlu1 %v801_v59, %s1330_s30  ;;  %s1124_s30 = sshll.u32 %s1389_s22, 4 }
 0x356   : > { %823 = vrot.lane.b32.xlu2 %v801_v59, %s1331_s6  ;;  %845 = vrot.lane.b32.xlu0 %v801_v59, %s1332_s7 }
 0x357   : > { %847 = vrot.lane.b32.xlu1 %v802_v61, %s1332_s7  ;;  %s1008_s7 = scalar_lea.hbm %s1818_s5, %s1124_s30 }
 0x35e   : > { %835 = vrot.lane.b32.xlu2 %v802_v61, %s1333_s8  ;;  %825 = vrot.lane.b32.xlu0 %v802_v61, %s1331_s6 }
 0x35f   : > { %833 = vrot.lane.b32.xlu1 %v801_v59, %s1333_s8  ;;  %s232_s8 = scalar_lea.vmem [#allocation6], %s1768_s26 }
 0x366   : > { %813 = vrot.lane.b32.xlu2 %v801_v59, %s1334_s9  ;;  %803 = vrot.lane.b32.xlu0 %v801_v59, %s1335_s10 }
 0x367   : > { %805 = vrot.lane.b32.xlu1 %v802_v61, %s1335_s10  ;;  %s1012_s10 = sshll.u32 %s1008_s7, 4  ;;  %s1013_s10 = int_to_ptr.hbm [resolvable:$true] %s1012_s10 }
 0x368   : > { %s1272_s12 = sshra.s32 %s1013_s10, 4  ;;  %s1273_s12 = int_to_ptr.hbm [resolvable:$true] %s1272_s12 }
 0x369   : > { %s1274_s13 = scalar_lea.hbm %s1273_s12, 16  ;;  %p1279_p3 = scmp.lt.s32.totalorder %s1273_s12, %s1818_s5 }
 0x36a   : > { %p1275_p0 = scmp.ne.s32.totalorder %s1273_s12, %s1274_s13  ;;  %p1280_p4 = scmp.lt.s32.totalorder %s1278_s16, %s1274_s13 }
 0x36c   : > { %p1276_p1 = pnand %p1275_p0, %p1406_p5  ;;  %p1281_p7 = por %p1280_p4, %p1279_p3 }
 0x36e   : > { %815 = vrot.lane.b32.xlu0 %v802_v61, %s1334_s9  ;;  %s1010_s9 = sshll.u32 %s232_s8, 4  ;;  %p1277_p2 = pneg %p1276_p1  ;;  %s1011_s9 = int_to_ptr.vmem [resolvable:$true] %s1010_s9 }
 0x36f   : > { %259 = vperm.xlu1 %1187, %v251_v63  }
 0x370   : > { %p1282_p8 = pnand %p1281_p7, %p1277_p2 }
 0x3a0   : > { %v856_v0 = vpop.permute.xlu2 %855 }
 0x3a8   : > { %v868_v11 = vpop.permute.xlu2 %867 }
 0x3b0   : > { %v824_v29 = vpop.permute.xlu2 %823 }
 0x3b8   : > { %v876_v47 = vpop.permute.xlu0 %875  ;;  %v836_v39 = vpop.permute.xlu2 %835 }
 0x3b9   : > { %v878_v5 = vpop.permute.xlu1 %877 }
 0x3ba   : > { %v879_v48 = vsel %vm494_vm12, %v876_v47, %v878_v5  ;;  %v880_v6 = vsel %vm494_vm12, %v878_v5, %v876_v47  ;;  %vm1824_vm12 = vcmask 596992  }
 0x3bb   : > { %v881_v9 = vmul.f32 %v879_v48, %v1475_v49  ;;  %v882_v10 = vmul.f32 %v880_v6, %v1478_v50 }
 0x3bd   : > { %v915_v12 = vpack.c.bf16 %v905_v7, %v881_v9  ;;  %v916_v15 = vpack.c.bf16 %v906_v8, %v882_v10 }
 0x3bf   : > { %v921_v16 = vand.u32 %v915_v12, %v1486_v62  ;;  %v924_v17 = vand.u32 %v916_v15, %v1486_v62 }
 0x3c0   : > { %v858_v18 = vpop.permute.xlu0 %857  ;;  %v814_v63 = vpop.permute.xlu2 %813 }
 0x3c1   : > { %v866_v19 = vpop.permute.xlu1 %865  ;;  %v859_v22 = vsel %vm468_vm14, %v856_v0, %v858_v18  ;;  %v860_v23 = vsel %vm468_vm14, %v858_v18, %v856_v0  ;;  %929 = vmatpush.bf16.msrb.mxu2 %v921_v16  ;;  %942 = vmatpush.bf16.msrb.mxu3 %v924_v17  ;;  %vm1825_vm14 = vmmov %vm1824_vm12 }
 0x3c2   : > { %v869_v49 = vsel %vm481_vm15, %v866_v19, %v868_v11  ;;  %v870_v50 = vsel %vm481_vm15, %v868_v11, %v866_v19  ;;  %v861_v24 = vmul.f32 %v859_v22, %v1497_v3  ;;  %v862_v62 = vmul.f32 %v860_v23, %v1500_v4 }
 0x3c3   : > { %v871_v25 = vmul.f32 %v869_v49, %v1491_v1  ;;  %v872_v26 = vmul.f32 %v870_v50, %v1494_v2 }
 0x3c5   : > { %v913_v27 = vpack.c.bf16 %v871_v25, %v861_v24  ;;  %v914_v28 = vpack.c.bf16 %v872_v26, %v862_v62 }
 0x3c7   : > { %930 = vmatpush.bf16.msrb.mxu2 %v913_v27  ;;  %943 = vmatpush.bf16.msrb.mxu3 %v914_v28 }
 0x3c8   : > { %v846_v34 = vpop.permute.xlu0 %845 }
 0x3c9   : > { %v848_v35 = vpop.permute.xlu1 %847 }
 0x3ca   : > { %v849_v36 = vsel %vm455_vm0, %v846_v34, %v848_v35  ;;  %v850_v37 = vsel %vm455_vm0, %v848_v35, %v846_v34 }
 0x3cb   : > { %v851_v3 = vmul.f32 %v849_v36, %v1518_v20  ;;  %v852_v4 = vmul.f32 %v850_v37, %v1521_v21 }
 0x3cd   : > { %v911_v1 = vpack.c.bf16 %v851_v3, %v801_v59  ;;  %v912_v38 = vpack.c.bf16 %v852_v4, %v802_v61 }
 0x3cf   : > { %931 = vmatpush.bf16.msrb.mxu2 %v911_v1  ;;  %944 = vmatpush.bf16.msrb.mxu3 %v912_v38 }
 0x3d0   : > { %v826_v2 = vpop.permute.xlu0 %825 }
 0x3d1   : > { %v834_v40 = vpop.permute.xlu1 %833  ;;  %v827_v41 = vsel %vm427_vm2, %v824_v29, %v826_v2  ;;  %v828_v42 = vsel %vm427_vm2, %v826_v2, %v824_v29 }
 0x3d2   : > { %v837_v43 = vsel %vm440_vm1, %v834_v40, %v836_v39  ;;  %v838_v20 = vsel %vm440_vm1, %v836_v39, %v834_v40  ;;  %v829_v21 = vmul.f32 %v828_v42, %v1540_v32  ;;  %v830_v44 = vmul.f32 %v827_v41, %v1543_v33 }
 0x3d3   : > { %v839_v45 = vmul.f32 %v838_v20, %v1533_v30  ;;  %v840_v51 = vmul.f32 %v837_v43, %v1536_v31 }
 0x3d5   : > { %v909_v52 = vpack.c.bf16 %v839_v45, %v829_v21  ;;  %v910_v54 = vpack.c.bf16 %v840_v51, %v830_v44 }
 0x3d7   : > { %932 = vmatpush.bf16.msrb.mxu2 %v909_v52  ;;  %945 = vmatpush.bf16.msrb.mxu3 %v910_v54 }
 0x3d8   : > { %v804_v58 = vpop.permute.xlu0 %803 }
 0x3d9   : > { %v806_v59 = vpop.permute.xlu1 %805 }
 0x3da   : > { %v807_v60 = vsel %vm401_vm3, %v804_v58, %v806_v59  ;;  %v808_v61 = vsel %vm401_vm3, %v806_v59, %v804_v58 }
 0x3db   : > { %v809_v32 = vmul.f32 %v808_v61, %v1559_v53  ;;  %v810_v33 = vmul.f32 %v807_v60, %v1562_v55  ;;  %v1112_v53 = vld [vmem:[%s1817_s4 + $0x8] sm:$0xf] }
 0x3e0   : > { %v816_v30 = vpop.permute.xlu0 %815 }
 0x3e1   : > { %v817_v31 = vsel %vm414_vm4, %v814_v63, %v816_v30  ;;  %v818_v0 = vsel %vm414_vm4, %v816_v30, %v814_v63  ;;  %v260_v55 = vpop.permute.xlu1 %259 }
 0x3e2   : > { %v819_v47 = vmul.f32 %v818_v0, %v1566_v56  ;;  %v820_v5 = vmul.f32 %v817_v31, %v1569_v57  ;;  %v1738_v46 = vadd.f32 %v1659_v13, %v260_v55  ;;  %v1741_v56 = vadd.f32 %v1661_v14, %v260_v55 }
 0x3e4   : > { %v907_v48 = vpack.c.bf16 %v819_v47, %v809_v32  ;;  %v908_v6 = vpack.c.bf16 %v820_v5, %v810_v33  ;;  %v1101_v57 = vmul.f32 -1.442695, %v1738_v46  ;;  %v1102_v7 = vmul.f32 -1.442695, %v1741_v56 }
 0x3e6   : > { %933 = vmatpush.bf16.msrb.mxu2 %v907_v48  ;;  %946 = vmatpush.bf16.msrb.mxu3 %v908_v6  ;;  %1212 = vpow2.f32 %v1101_v57 }
 0x3e7   : > { %1214 = vpow2.f32 %v1102_v7 }
 0x3e9   : > { %1113 = vmatmul.msk.bf16.vlgmr.msrb.gmra.mxu2 %vm1824_vm12, %v1112_v53  ;;  %1114 = vmatmul.msk.bf16.vlgmr.msrb.gmra.mxu3 %vm1825_vm14, %v1112_v53 }
 0x3ec   : > { %v1213_v8 = vpop.eup %1212 }
 0x3ed   : > { %v1215_v9 = vpop.eup %1214  ;;  %v320_v10 = vadd.f32 1.0, %v1213_v8 }
 0x3ee   : > { %v321_v11 = vadd.f32 1.0, %v1215_v9 }
 0x3ef   : > { %1216 = vrcp.f32 %v320_v10  ;;  %v361_v29 = vand.u32 2147483647, %v320_v10  ;;  %v363_v36 = vand.u32 2147483648, %v320_v10  ;;  %vm357_vm0 = vweird.f32 %v320_v10 }
 0x3f0   : > { %1218 = vrcp.f32 %v321_v11  ;;  %vm372_vm1 = vweird.f32 %v321_v11  ;;  %v376_v39 = vand.u32 2147483647, %v321_v11  ;;  %v378_v40 = vand.u32 2147483648, %v321_v11 }
 0x3f1   : > { %vm1756_vm4 = vcmp.eq.f32.partialorder %v361_v29, 8.507059e+37  ;;  %v364_v43 = vor.u32 1.1754944e-38, %v363_v36 }
 0x3f2   : > { %vm377_vm10 = vcmp.eq.f32.partialorder %v376_v39, 8.507059e+37  ;;  %v379_v60 = vor.u32 1.1754944e-38, %v378_v40 }
 0x3f5   : > { %v1217_v16 = vpop.eup %1216 }
 0x3f6   : > { %v1219_v17 = vpop.eup %1218  ;;  %v353_v18 = vmul.f32 %v1217_v16, %v320_v10  ;;  %vm358_vm15 = vweird.f32 %v1217_v16 }
 0x3f7   : > { %v368_v19 = vmul.f32 %v1219_v17, %v321_v11  ;;  %vm373_vm2 = vweird.f32 %v1219_v17  ;;  %vm1752_vm3 = vmor %vm357_vm0, %vm358_vm15 }
 0x3f8   : > { %v354_v24 = vsub.f32 1.0, %v353_v18  ;;  %vm1762_vm7 = vmor %vm372_vm1, %vm373_vm2 }
 0x3f9   : > { %v369_v26 = vsub.f32 1.0, %v368_v19 }
 0x3fa   : > { %v355_v27 = vmul.f32 %v1217_v16, %v354_v24 }
 0x3fb   : > { %v370_v28 = vmul.f32 %v1219_v17, %v369_v26 }
 0x3fc   : > { %v356_v35 = vadd.f32 %v1217_v16, %v355_v27 }
 0x3fd   : > { %v371_v4 = vadd.f32 %v1219_v17, %v370_v28 }
 0x3fe   : > { %v360_v42 = vsel %vm1752_vm3, %v1217_v16, %v356_v35 }
 0x3ff   : > { %v375_v54 = vsel %vm1762_vm7, %v1219_v17, %v371_v4  ;;  %v365_v32 = vsel %vm1756_vm4, %v364_v43, %v360_v42 }
 0x400   : > { %v380_v30 = vsel %vm377_vm10, %v379_v60, %v375_v54  ;;  %v384_v48 = vmul.f32 %v365_v32, %v1738_v46 }
 0x401   : > { %v385_v55 = vmul.f32 %v380_v30, %v1741_v56 }
 0x46c   : > { %v1745_v12 = vpop.f32.mrf.mxu2  ;;  %v1747_v15 = vpop.f32.mrf.mxu3 }
 0x46d   : > { %v1115_v13 = vmul.f32 -1.442695, %v1745_v12  ;;  %v1116_v14 = vmul.f32 -1.442695, %v1747_v15 }
 0x46f   : > { %1220 = vpow2.f32 %v1115_v13 }
 0x470   : > { %1222 = vpow2.f32 %v1116_v14 }
 0x474   : > { %v937_v22 = vpop.f32.mrf.mxu2  ;;  %v950_v23 = vpop.f32.mrf.mxu3 }
 0x475   : > { %v1221_v49 = vpop.eup %1220 }
 0x476   : > { %v1223_v50 = vpop.eup %1222  ;;  %v958_v62 = vadd.f32 1.0, %v1221_v49 }
 0x477   : > { %v959_v25 = vadd.f32 1.0, %v1223_v50 }
 0x478   : > { %1224 = vrcp.f32 %v958_v62  ;;  %v971_v20 = vand.u32 2147483648, %v958_v62  ;;  %v969_v51 = vand.u32 2147483647, %v958_v62  ;;  %vm965_vm11 = vweird.f32 %v958_v62 }
 0x479   : > { %1226 = vrcp.f32 %v959_v25  ;;  %v986_v52 = vand.u32 2147483648, %v959_v25  ;;  %v984_v59 = vand.u32 2147483647, %v959_v25  ;;  %vm980_vm5 = vweird.f32 %v959_v25 }
 0x47a   : > { %v972_v33 = vor.u32 1.1754944e-38, %v971_v20  ;;  %vm970_vm6 = vcmp.eq.f32.partialorder %v969_v51, 8.507059e+37 }
 0x47b   : > { %v987_v0 = vor.u32 1.1754944e-38, %v986_v52  ;;  %vm985_vm14 = vcmp.eq.f32.partialorder %v984_v59, 8.507059e+37 }
 0x47e   : > { %v1225_v34 = vpop.eup %1224 }
 0x47f   : > { %v1227_v37 = vpop.eup %1226  ;;  %v961_v3 = vmul.f32 %v1225_v34, %v958_v62  ;;  %vm966_vm8 = vweird.f32 %v1225_v34 }
 0x480   : > { %v976_v1 = vmul.f32 %v1227_v37, %v959_v25  ;;  %vm981_vm9 = vweird.f32 %v1227_v37  ;;  %vm967_vm13 = vmor %vm965_vm11, %vm966_vm8 }
 0x481   : > { %v962_v41 = vsub.f32 1.0, %v961_v3  ;;  %vm982_vm12 = vmor %vm980_vm5, %vm981_vm9 }
 0x482   : > { %v977_v21 = vsub.f32 1.0, %v976_v1 }
 0x483   : > { %v963_v45 = vmul.f32 %v1225_v34, %v962_v41 }
 0x484   : > { %v978_v58 = vmul.f32 %v1227_v37, %v977_v21 }
 0x485   : > { %v964_v61 = vadd.f32 %v1225_v34, %v963_v45 }
 0x486   : > { %v979_v63 = vadd.f32 %v1227_v37, %v978_v58 }
 0x487   : > { %v968_v31 = vsel %vm967_vm13, %v1225_v34, %v964_v61 }
 0x488   : > { %v973_v47 = vsel %vm970_vm6, %v972_v33, %v968_v31  ;;  %v983_v5 = vsel %vm982_vm12, %v1227_v37, %v979_v63 }
 0x489   : > { %v990_v6 = vmul.f32 %v973_v47, %v1745_v12  ;;  %v988_v53 = vsel %vm985_vm14, %v987_v0, %v983_v5 }
 0x48a   : > { %v991_v57 = vmul.f32 %v988_v53, %v1747_v15 }
 0x48b   : > { %v992_v7 = vadd.f32 %v990_v6, %v384_v48 }
 0x48c   : > { %v993_v8 = vadd.f32 %v991_v57, %v385_v55 }
 0x48d   : > { %994 = vst [vmem:[%s232_s8] sm:$0xff] %v992_v7 }
 0x48e   : > { %995 = vst [vmem:[%s232_s8 + $0x8] sm:$0xff] %v993_v8 }
 0x48f   : > { %1285 = shalt.err (!%p1282_p8)
}
 0x490   : > { %1129 = dma.vmem_to_hbm [thread:$0]  (%p1406_p5), %s1011_s9, 256, %s1013_s10, %s997_s11  }
 0x491 PF: > { %p1141_p9 = scmp.ge.s32.totalorder %s1324_s21, 2  ;;  %s1024_s25 = sand.u32 1, %s1312_s18  }
 0x492   : > { %s1025_s26 = scalar_lea.sflag [#allocation5], %s1024_s25 }
 0x493   : > { %p1136_p10 = pnand %p1141_p9, %p1410_p6 }
 0x495   : > { %p1137_p11 = pneg %p1136_p10 }
 0x497   : > { %1307 = dma.done.wait (%p1137_p11), %s1025_s26, 256  }
 0x498   : > { %1309 = vsyncadd (%p1137_p11), %s1025_s26, 4294967040  ;;  %p16_p12 = scmp.ge.s32.totalorder %s1393_s24, 4   ;;  %s1832_s18 = smov %s1316_s19 }
 0x499   : > { %s1833_s19 = smov %s1320_s20  ;;  %s1834_s20 = smov %s1404_s27 }
 0x49a   : > { %s1835_s21 = smov %s1393_s24  ;;  %18 = sbr.rel (!%p16_p12) target bundleno = 4 (0x4), region = 83 }
 0x49f   :  { %1031 = vsyncpa [#allocation4], 1 }
 0x4a0   :  { %1033 = vsyncpa [#allocation4 + $0x1], 1 }
 0x4a1   :  { %1034 = vsyncpa [#allocation5], 1 }
 0x4a2   :  { %1036 = vsyncpa [#allocation5 + $0x1], 1 }

</bundles_post_ra>
